<compile_context>
chip_gen: v6e
topology: v6e:2x2x1
jax: 0.10.0
libtpu: 0.0.40
codegen_flags: <defaults>
</compile_context>

<pallas_src>
import jax
import jax.numpy as jnp
import numpy as np
from jax import lax
from jax.experimental import pallas as pl
from jax.experimental.pallas import tpu as pltpu

LN_EPS = 1e-5


# ----------------------------------------------------------------------------
# Kernel 1: fused conv stack (grid over batch, "parallel")
# ----------------------------------------------------------------------------
# Layout inside the kernel: activations are 2-D (rows = flattened spatial with
# row-stride W/2, lanes = channels).  A 3x3 tap (kh, kw) is then just a
# unit-stride row-range slice + a small matmul, so NO reshapes/gathers are
# needed in the hot loop.  Columns j >= Wo of each spatial row are "garbage"
# (never read by valid outputs; zeroed out by the permuted first MLP weight).
def _make_conv_kernel(n_layers, W2, P_list, nf):
    def kernel(*refs):
        x_ref = refs[0]          # (4, H2*W2, Cin)  4 stride-2 phase images
        o_ref = refs[-2]         # (1, P_last, nf)
        h_scr = refs[-1]         # VMEM scratch (P_list[0], nf)
        wb = refs[1:-2]          # w1, b1, w2, b2, ...

        # ---- layer 1: stride-2 conv = 9 tap matmuls over the phase images ----
        P1 = P_list[0]
        w1 = wb[0][...]          # (9, Cin, nf)
        acc = jnp.zeros((P1, nf), jnp.float32)
        for kh in range(3):
            for kw in range(3):
                ph = (kh % 2) * 2 + (kw % 2)
                r = (kh // 2) * W2 + (kw // 2)
                acc = acc + jnp.dot(x_ref[ph, r:r + P1, :], w1[kh * 3 + kw],
                                    preferred_element_type=jnp.float32)
        acc = acc + wb[1][...]
        h = jnp.maximum(acc, 0.0)          # ReLU after first conv

        if n_layers == 1:
            o_ref[...] = h[None].astype(o_ref.dtype)
            return

        h_scr[...] = h
        # ---- layers 2..n: stride-1 convs, tap windows read from scratch ----
        for l in range(1, n_layers):
            Pl = P_list[l]
            wl = wb[2 * l][...]            # (9, nf, nf)
            acc = jnp.zeros((Pl, nf), jnp.float32)
            for kh in range(3):
                for kw in range(3):
                    r = kh * W2 + kw
                    acc = acc + jnp.dot(h_scr[r:r + Pl, :], wl[kh * 3 + kw],
                                        preferred_element_type=jnp.float32)
            acc = acc + wb[2 * l + 1][...]
            if l < n_layers - 1:
                h_scr[0:Pl, :] = jnp.maximum(acc, 0.0)       # ReLU before next conv
            else:
                o_ref[...] = acc[None].astype(o_ref.dtype)   # last conv: no act

    return kernel


def conv_stack(x_phases, conv_wb, *, W2, P_list):
    """x_phases: (B*4, H2*W2, Cin); returns (B, P_last, num_filters)."""
    B4, HW2, Cin = x_phases.shape
    B = B4 // 4
    n_layers = len(conv_wb)
    nf = conv_wb[0][0].shape[-1]
    P_last = P_list[-1]

    inputs = [x_phases]
    in_specs = [pl.BlockSpec((4, HW2, Cin), lambda b: (b, 0, 0))]
    for (w, bias) in conv_wb:
        inputs += [w, bias]
        in_specs += [pl.BlockSpec(w.shape, lambda b: (0, 0, 0)),
                     pl.BlockSpec(bias.shape, lambda b: (0, 0))]

    return pl.pallas_call(
        _make_conv_kernel(n_layers, W2, P_list, nf),
        grid=(B,),
        in_specs=in_specs,
        out_specs=pl.BlockSpec((1, P_last, nf), lambda b: (b, 0, 0)),
        out_shape=jax.ShapeDtypeStruct((B, P_last, nf), jnp.float32),
        scratch_shapes=[pltpu.VMEM((P_list[0], nf), jnp.float32)],
        compiler_params=pltpu.CompilerParams(
            dimension_semantics=("parallel",)),
    )(*inputs)


# ----------------------------------------------------------------------------
# Kernel 2: fused MLP stack  (all Linear+LN+ReLU layers + final Linear + clamp)
# ----------------------------------------------------------------------------
def _make_mlp_kernel(n_lin, hid_dim, clamp):
    inv_n = 1.0 / float(hid_dim)

    def kernel(*refs):
        h_ref = refs[0]
        o_ref = refs[-1]
        prm = refs[1:-1]         # per layer: w, b, g, beta ; then wf, bf
        h = h_ref[...]
        for i in range(n_lin):
            w = prm[4 * i][...]
            b = prm[4 * i + 1][...]
            g = prm[4 * i + 2][...]
            beta = prm[4 * i + 3][...]
            y = jnp.dot(h, w, preferred_element_type=jnp.float32) + b
            # single-pass LayerNorm: one sum + one sum-of-squares reduction
            mean = jnp.sum(y, axis=-1, keepdims=True) * inv_n
            msq = jnp.sum(y * y, axis=-1, keepdims=True) * inv_n
            y = (y - mean) * lax.rsqrt(msq - mean * mean + LN_EPS)
            h = jnp.maximum(y * g + beta, 0.0)
        # final (hid, 1) linear as a lane-reduce epilogue + clamp
        wf = prm[4 * n_lin][...]        # (1, hid)
        bf = prm[4 * n_lin + 1][...]    # (1, 1)
        out = jnp.sum(h * wf, axis=-1, keepdims=True) + bf
        o_ref[...] = jnp.clip(out, -clamp, clamp).astype(o_ref.dtype)

    return kernel


def mlp_stack(h0, lin_wb, final_wb, *, clamp):
    B, F = h0.shape
    n_lin = len(lin_wb)
    hid = lin_wb[0][0].shape[-1]
    # row (M) tiling: whole batch in one block at small B, 512-row tiles at scale
    TB = B if (B <= 512 or B % 512 != 0) else 512

    inputs = [h0]
    in_specs = [pl.BlockSpec((TB, F), lambda m: (m, 0))]
    for layer in lin_wb:                 # (w, b, g, beta)
        for a in layer:
            inputs.append(a)
            in_specs.append(pl.BlockSpec(a.shape, lambda m: (0, 0)))
    for a in final_wb:                   # (wf, bf)
        inputs.append(a)
        in_specs.append(pl.BlockSpec(a.shape, lambda m: (0, 0)))

    return pl.pallas_call(
        _make_mlp_kernel(n_lin, hid, clamp),
        grid=(pl.cdiv(B, TB),),
        in_specs=in_specs,
        out_specs=pl.BlockSpec((TB, 1), lambda m: (m, 0)),
        out_shape=jax.ShapeDtypeStruct((B, 1), jnp.float32),
        compiler_params=pltpu.CompilerParams(
            dimension_semantics=("parallel",)),
    )(*inputs)


# ----------------------------------------------------------------------------
# Parameter init (PyTorch layout) and one-time kernel-layout preparation
# ----------------------------------------------------------------------------
def init_params(key, input_shape, input_dim, num_filters, num_layer_blocks, hid_dim):
    C, H, W = input_shape
    keys = iter(jax.random.split(key, 64))

    def uinit(shape, fan_in):
        bound = 1.0 / (fan_in ** 0.5)
        return jax.random.uniform(next(keys), shape, jnp.float32, -bound, bound)

    convs = [dict(w=uinit((num_filters, C, 3, 3), C * 9), b=uinit((num_filters,), C * 9))]
    for _ in range(num_layer_blocks - 1):
        convs.append(dict(w=uinit((num_filters, num_filters, 3, 3), num_filters * 9),
                          b=uinit((num_filters,), num_filters * 9)))

    out_dim = (H - 3) // 2 + 1
    for _ in range(num_layer_blocks - 1):
        out_dim -= 2
    flat_dim = num_filters * out_dim * out_dim + input_dim

    lins = []
    in_d = flat_dim
    for _ in range(num_layer_blocks):
        lins.append(dict(w=uinit((in_d, hid_dim), in_d), b=uinit((hid_dim,), in_d),
                         g=jnp.ones((hid_dim,), jnp.float32),
                         beta=jnp.zeros((hid_dim,), jnp.float32)))
        in_d = hid_dim
    final = dict(w=uinit((hid_dim, 1), hid_dim), b=uinit((1,), hid_dim))
    return dict(convs=convs, lins=lins, final=final)


def prepare_params(params, input_shape, input_dim):
    """One-time repack of PyTorch-layout params into kernel layout."""
    C, H, W = input_shape
    assert H % 2 == 0 and W % 2 == 0, "even spatial dims required"
    W2 = W // 2
    convs = params["convs"]
    n_layers = len(convs)

    Ho, Wo = (H - 3) // 2 + 1, (W - 3) // 2 + 1
    dims = [(Ho, Wo)]
    for _ in range(n_layers - 1):
        Ho, Wo = Ho - 2, Wo - 2
        dims.append((Ho, Wo))
    P_list = [(h - 1) * W2 + w for (h, w) in dims]

    # conv weights OIHW -> (9 taps, Cin, Cout)
    conv_wb = []
    for cp in convs:
        w = cp["w"]
        co, ci = w.shape[0], w.shape[1]
        wk = jnp.transpose(w, (2, 3, 1, 0)).reshape(9, ci, co)
        conv_wb.append((wk, cp["b"].reshape(1, co)))

    nf = convs[0]["w"].shape[0]
    Ho_f, Wo_f = dims[-1]
    P_last = P_list[-1]
    F_k = P_last * nf + input_dim

    # first MLP weight: fold NCHW-flatten permutation + garbage-column zeroing
    lin0 = params["lins"][0]
    hid = lin0["w"].shape[1]
    c_ix, i_ix, j_ix = np.meshgrid(np.arange(nf), np.arange(Ho_f), np.arange(Wo_f),
                                   indexing="ij")
    pt_rows = (c_ix * (Ho_f * Wo_f) + i_ix * Wo_f + j_ix).reshape(-1)
    k_rows = ((i_ix * W2 + j_ix) * nf + c_ix).reshape(-1)
    w0 = jnp.zeros((F_k, hid), jnp.float32).at[k_rows].set(lin0["w"][pt_rows])
    if input_dim:
        w0 = w0.at[P_last * nf + np.arange(input_dim)].set(
            lin0["w"][nf * Ho_f * Wo_f:])

    lin_wb = [(w0, lin0["b"].reshape(1, hid), lin0["g"].reshape(1, hid),
               lin0["beta"].reshape(1, hid))]
    for lp in params["lins"][1:]:
        lin_wb.append((lp["w"], lp["b"].reshape(1, hid),
                       lp["g"].reshape(1, hid), lp["beta"].reshape(1, hid)))
    final_wb = (params["final"]["w"].reshape(1, hid),
                params["final"]["b"].reshape(1, 1))
    meta = dict(W2=W2, P_list=P_list, n_layers=n_layers, nf=nf)
    return dict(conv_wb=conv_wb, lin_wb=lin_wb, final_wb=final_wb, meta=meta)


# ----------------------------------------------------------------------------
# CNNDisc forward (Pallas)
# ----------------------------------------------------------------------------
def cnn_disc_forward(prep, obs, vec=None, clamp_magnitude=10.0):
    meta = prep["meta"]
    W2 = meta["W2"]
    B, C, H, W = obs.shape
    # space-to-depth: NCHW -> 4 stride-2 phase images per sample, spatial
    # flattened, channels on the lane axis (single layout pass; replaces the
    # old host-side 9-slice im2col).
    x = jnp.transpose(obs, (0, 2, 3, 1))                   # (B, H, W, C)
    x = x.reshape(B, H // 2, 2, W2, 2, C)
    x = jnp.transpose(x, (0, 2, 4, 1, 3, 5))               # (B, 2, 2, H2, W2, C)
    x = x.reshape(B * 4, (H // 2) * W2, C)

    feats = conv_stack(x, prep["conv_wb"], W2=W2, P_list=meta["P_list"])
    flat = feats.reshape(B, -1)                            # contiguous, free
    if vec is not None:
        flat = jnp.concatenate([flat, vec], axis=-1)
    return mlp_stack(flat, prep["lin_wb"], prep["final_wb"], clamp=clamp_magnitude)


# ----------------------------------------------------------------------------
# Pure-JAX reference (PyTorch-layout params) for validation
# ----------------------------------------------------------------------------
def ref_forward(params, obs, vec=None, clamp_magnitude=10.0):
    def conv_ref(x, w, b, s):
        y = lax.conv_general_dilated(
            x, w, (s, s), "VALID", dimension_numbers=("NCHW", "OIHW", "NCHW"))
        return y + b[None, :, None, None]

    convs = params["convs"]
    x = jnp.maximum(conv_ref(obs, convs[0]["w"], convs[0]["b"], 2), 0.0)
    for cp in convs[1:]:
        x = jnp.maximum(x, 0.0)
        x = conv_ref(x, cp["w"], cp["b"], 1)
    h = x.reshape(x.shape[0], -1)
    if vec is not None:
        h = jnp.concatenate([h, vec], axis=-1)
    for lp in params["lins"]:
        h = h @ lp["w"] + lp["b"]
        mean = jnp.mean(h, -1, keepdims=True)
        var = jnp.mean((h - mean) ** 2, -1, keepdims=True)
        h = (h - mean) * lax.rsqrt(var + LN_EPS) * lp["g"] + lp["beta"]
        h = jnp.maximum(h, 0.0)
    out = h @ params["final"]["w"] + params["final"]["b"]
    return jnp.clip(out, -clamp_magnitude, clamp_magnitude)


if __name__ == "__main__":
    key = jax.random.PRNGKey(0)
    kp, kx = jax.random.split(key)

    input_shape = (4, 16, 16)   # (C, H, W)
    batch = 2
    params = init_params(kp, input_shape, input_dim=0, num_filters=32,
                         num_layer_blocks=2, hid_dim=32)
    prep = prepare_params(params, input_shape, input_dim=0)
    obs = jax.random.normal(kx, (batch,) + input_shape, jnp.float32)

    # TODO(synk): hid_act='tanh' variant of the module is not implemented (relu only).
    fwd = jax.jit(lambda o: cnn_disc_forward(prep, o, clamp_magnitude=10.0))
    out = jax.block_until_ready(fwd(obs))

    ref = ref_forward(params, obs)
    assert out.shape == (batch, 1), out.shape
    np.testing.assert_allclose(np.asarray(out), np.asarray(ref), rtol=1e-2, atol=1e-2)
    print("KERNEL_OK")
</pallas_src>

<mosaic_0001>
module attributes {stable_mosaic.version = 11 : i64} {
  func.func @kernel(%arg0: i32, %arg1: memref<4x64x4xf32, #tpu.memory_space<vmem>>, %arg2: memref<9x4x32xf32, #tpu.memory_space<vmem>>, %arg3: memref<1x32xf32, #tpu.memory_space<vmem>>, %arg4: memref<9x32x32xf32, #tpu.memory_space<vmem>>, %arg5: memref<1x32xf32, #tpu.memory_space<vmem>>, %arg6: memref<1x37x32xf32, #tpu.memory_space<vmem>>, %arg7: memref<55x32xf32, #tpu.memory_space<vmem>>) attributes {dimension_semantics = [#tpu.dimension_semantics<parallel>], iteration_bounds = array<i64: 2>, scalar_prefetch = 0 : i64, scratch_operands = 1 : i64, tpu.core_type = #tpu.core_type<tc>, window_params = [{transform_indices = @transform_0, window_bounds = array<i64: 4, 64, 4>}, {pipeline_mode = #tpu.pipeline_mode<synchronous>, transform_indices = @transform_1, window_bounds = array<i64: 9, 4, 32>}, {pipeline_mode = #tpu.pipeline_mode<synchronous>, transform_indices = @transform_2, window_bounds = array<i64: 1, 32>}, {pipeline_mode = #tpu.pipeline_mode<synchronous>, transform_indices = @transform_3, window_bounds = array<i64: 9, 32, 32>}, {pipeline_mode = #tpu.pipeline_mode<synchronous>, transform_indices = @transform_4, window_bounds = array<i64: 1, 32>}, {transform_indices = @transform_5, window_bounds = array<i64: 1, 37, 32>}]} {
    %c0 = arith.constant 0 : index
    %c0_0 = arith.constant 0 : index
    %c0_1 = arith.constant 0 : index
    %0 = vector.load %arg2[%c0, %c0_0, %c0_1] : memref<9x4x32xf32, #tpu.memory_space<vmem>>, vector<9x4x32xf32>
    %cst = arith.constant 0.000000e+00 : f32
    %1 = vector.broadcast %cst : f32 to vector<55x32xf32>
    %c0_2 = arith.constant 0 : index
    %c0_3 = arith.constant 0 : index
    %c0_4 = arith.constant 0 : index
    %2 = vector.load %arg1[%c0_2, %c0_3, %c0_4] : memref<4x64x4xf32, #tpu.memory_space<vmem>>, vector<1x55x4xf32>
    %3 = vector.shape_cast %2 : vector<1x55x4xf32> to vector<55x4xf32>
    %4 = vector.extract_strided_slice %0 {offsets = [0, 0, 0], sizes = [1, 4, 32], strides = [1, 1, 1]} : vector<9x4x32xf32> to vector<1x4x32xf32>
    %5 = vector.shape_cast %4 : vector<1x4x32xf32> to vector<4x32xf32>
    %cst_5 = arith.constant dense<0.000000e+00> : vector<55x32xf32>
    %6 = tpu.matmul %3, %5, %cst_5 {dimension_numbers = #tpu.dot_dimension_numbers<[1], [0], [0], [1], [0, 0, 1, 1], [], []>} : vector<55x4xf32>, vector<4x32xf32>, vector<55x32xf32> -> vector<55x32xf32>
    %7 = arith.addf %1, %6 : vector<55x32xf32>
    %c1 = arith.constant 1 : index
    %c0_6 = arith.constant 0 : index
    %c0_7 = arith.constant 0 : index
    %8 = vector.load %arg1[%c1, %c0_6, %c0_7] : memref<4x64x4xf32, #tpu.memory_space<vmem>>, vector<1x55x4xf32>
    %9 = vector.shape_cast %8 : vector<1x55x4xf32> to vector<55x4xf32>
    %10 = vector.extract_strided_slice %0 {offsets = [1, 0, 0], sizes = [1, 4, 32], strides = [1, 1, 1]} : vector<9x4x32xf32> to vector<1x4x32xf32>
    %11 = vector.shape_cast %10 : vector<1x4x32xf32> to vector<4x32xf32>
    %cst_8 = arith.constant dense<0.000000e+00> : vector<55x32xf32>
    %12 = tpu.matmul %9, %11, %cst_8 {dimension_numbers = #tpu.dot_dimension_numbers<[1], [0], [0], [1], [0, 0, 1, 1], [], []>} : vector<55x4xf32>, vector<4x32xf32>, vector<55x32xf32> -> vector<55x32xf32>
    %13 = arith.addf %7, %12 : vector<55x32xf32>
    %c0_9 = arith.constant 0 : index
    %c1_10 = arith.constant 1 : index
    %c0_11 = arith.constant 0 : index
    %14 = vector.load %arg1[%c0_9, %c1_10, %c0_11] : memref<4x64x4xf32, #tpu.memory_space<vmem>>, vector<1x55x4xf32>
    %15 = vector.shape_cast %14 : vector<1x55x4xf32> to vector<55x4xf32>
    %16 = vector.extract_strided_slice %0 {offsets = [2, 0, 0], sizes = [1, 4, 32], strides = [1, 1, 1]} : vector<9x4x32xf32> to vector<1x4x32xf32>
    %17 = vector.shape_cast %16 : vector<1x4x32xf32> to vector<4x32xf32>
    %cst_12 = arith.constant dense<0.000000e+00> : vector<55x32xf32>
    %18 = tpu.matmul %15, %17, %cst_12 {dimension_numbers = #tpu.dot_dimension_numbers<[1], [0], [0], [1], [0, 0, 1, 1], [], []>} : vector<55x4xf32>, vector<4x32xf32>, vector<55x32xf32> -> vector<55x32xf32>
    %19 = arith.addf %13, %18 : vector<55x32xf32>
    %c2 = arith.constant 2 : index
    %c0_13 = arith.constant 0 : index
    %c0_14 = arith.constant 0 : index
    %20 = vector.load %arg1[%c2, %c0_13, %c0_14] : memref<4x64x4xf32, #tpu.memory_space<vmem>>, vector<1x55x4xf32>
    %21 = vector.shape_cast %20 : vector<1x55x4xf32> to vector<55x4xf32>
    %22 = vector.extract_strided_slice %0 {offsets = [3, 0, 0], sizes = [1, 4, 32], strides = [1, 1, 1]} : vector<9x4x32xf32> to vector<1x4x32xf32>
    %23 = vector.shape_cast %22 : vector<1x4x32xf32> to vector<4x32xf32>
    %cst_15 = arith.constant dense<0.000000e+00> : vector<55x32xf32>
    %24 = tpu.matmul %21, %23, %cst_15 {dimension_numbers = #tpu.dot_dimension_numbers<[1], [0], [0], [1], [0, 0, 1, 1], [], []>} : vector<55x4xf32>, vector<4x32xf32>, vector<55x32xf32> -> vector<55x32xf32>
    %25 = arith.addf %19, %24 : vector<55x32xf32>
    %c3 = arith.constant 3 : index
    %c0_16 = arith.constant 0 : index
    %c0_17 = arith.constant 0 : index
    %26 = vector.load %arg1[%c3, %c0_16, %c0_17] : memref<4x64x4xf32, #tpu.memory_space<vmem>>, vector<1x55x4xf32>
    %27 = vector.shape_cast %26 : vector<1x55x4xf32> to vector<55x4xf32>
    %28 = vector.extract_strided_slice %0 {offsets = [4, 0, 0], sizes = [1, 4, 32], strides = [1, 1, 1]} : vector<9x4x32xf32> to vector<1x4x32xf32>
    %29 = vector.shape_cast %28 : vector<1x4x32xf32> to vector<4x32xf32>
    %cst_18 = arith.constant dense<0.000000e+00> : vector<55x32xf32>
    %30 = tpu.matmul %27, %29, %cst_18 {dimension_numbers = #tpu.dot_dimension_numbers<[1], [0], [0], [1], [0, 0, 1, 1], [], []>} : vector<55x4xf32>, vector<4x32xf32>, vector<55x32xf32> -> vector<55x32xf32>
    %31 = arith.addf %25, %30 : vector<55x32xf32>
    %c2_19 = arith.constant 2 : index
    %c1_20 = arith.constant 1 : index
    %c0_21 = arith.constant 0 : index
    %32 = vector.load %arg1[%c2_19, %c1_20, %c0_21] : memref<4x64x4xf32, #tpu.memory_space<vmem>>, vector<1x55x4xf32>
    %33 = vector.shape_cast %32 : vector<1x55x4xf32> to vector<55x4xf32>
    %34 = vector.extract_strided_slice %0 {offsets = [5, 0, 0], sizes = [1, 4, 32], strides = [1, 1, 1]} : vector<9x4x32xf32> to vector<1x4x32xf32>
    %35 = vector.shape_cast %34 : vector<1x4x32xf32> to vector<4x32xf32>
    %cst_22 = arith.constant dense<0.000000e+00> : vector<55x32xf32>
    %36 = tpu.matmul %33, %35, %cst_22 {dimension_numbers = #tpu.dot_dimension_numbers<[1], [0], [0], [1], [0, 0, 1, 1], [], []>} : vector<55x4xf32>, vector<4x32xf32>, vector<55x32xf32> -> vector<55x32xf32>
    %37 = arith.addf %31, %36 : vector<55x32xf32>
    %c0_23 = arith.constant 0 : index
    %c8 = arith.constant 8 : index
    %c0_24 = arith.constant 0 : index
    %38 = vector.load %arg1[%c0_23, %c8, %c0_24] : memref<4x64x4xf32, #tpu.memory_space<vmem>>, vector<1x55x4xf32>
    %39 = vector.shape_cast %38 : vector<1x55x4xf32> to vector<55x4xf32>
    %40 = vector.extract_strided_slice %0 {offsets = [6, 0, 0], sizes = [1, 4, 32], strides = [1, 1, 1]} : vector<9x4x32xf32> to vector<1x4x32xf32>
    %41 = vector.shape_cast %40 : vector<1x4x32xf32> to vector<4x32xf32>
    %cst_25 = arith.constant dense<0.000000e+00> : vector<55x32xf32>
    %42 = tpu.matmul %39, %41, %cst_25 {dimension_numbers = #tpu.dot_dimension_numbers<[1], [0], [0], [1], [0, 0, 1, 1], [], []>} : vector<55x4xf32>, vector<4x32xf32>, vector<55x32xf32> -> vector<55x32xf32>
    %43 = arith.addf %37, %42 : vector<55x32xf32>
    %c1_26 = arith.constant 1 : index
    %c8_27 = arith.constant 8 : index
    %c0_28 = arith.constant 0 : index
    %44 = vector.load %arg1[%c1_26, %c8_27, %c0_28] : memref<4x64x4xf32, #tpu.memory_space<vmem>>, vector<1x55x4xf32>
    %45 = vector.shape_cast %44 : vector<1x55x4xf32> to vector<55x4xf32>
    %46 = vector.extract_strided_slice %0 {offsets = [7, 0, 0], sizes = [1, 4, 32], strides = [1, 1, 1]} : vector<9x4x32xf32> to vector<1x4x32xf32>
    %47 = vector.shape_cast %46 : vector<1x4x32xf32> to vector<4x32xf32>
    %cst_29 = arith.constant dense<0.000000e+00> : vector<55x32xf32>
    %48 = tpu.matmul %45, %47, %cst_29 {dimension_numbers = #tpu.dot_dimension_numbers<[1], [0], [0], [1], [0, 0, 1, 1], [], []>} : vector<55x4xf32>, vector<4x32xf32>, vector<55x32xf32> -> vector<55x32xf32>
    %49 = arith.addf %43, %48 : vector<55x32xf32>
    %c0_30 = arith.constant 0 : index
    %c9 = arith.constant 9 : index
    %c0_31 = arith.constant 0 : index
    %50 = vector.load %arg1[%c0_30, %c9, %c0_31] : memref<4x64x4xf32, #tpu.memory_space<vmem>>, vector<1x55x4xf32>
    %51 = vector.shape_cast %50 : vector<1x55x4xf32> to vector<55x4xf32>
    %52 = vector.extract_strided_slice %0 {offsets = [8, 0, 0], sizes = [1, 4, 32], strides = [1, 1, 1]} : vector<9x4x32xf32> to vector<1x4x32xf32>
    %53 = vector.shape_cast %52 : vector<1x4x32xf32> to vector<4x32xf32>
    %cst_32 = arith.constant dense<0.000000e+00> : vector<55x32xf32>
    %54 = tpu.matmul %51, %53, %cst_32 {dimension_numbers = #tpu.dot_dimension_numbers<[1], [0], [0], [1], [0, 0, 1, 1], [], []>} : vector<55x4xf32>, vector<4x32xf32>, vector<55x32xf32> -> vector<55x32xf32>
    %55 = arith.addf %49, %54 : vector<55x32xf32>
    %c0_33 = arith.constant 0 : index
    %c0_34 = arith.constant 0 : index
    %56 = vector.load %arg3[%c0_33, %c0_34] : memref<1x32xf32, #tpu.memory_space<vmem>>, vector<1x32xf32>
    %57 = vector.broadcast %56 : vector<1x32xf32> to vector<55x32xf32>
    %58 = arith.addf %55, %57 : vector<55x32xf32>
    %cst_35 = arith.constant 0.000000e+00 : f32
    %59 = vector.broadcast %cst_35 : f32 to vector<55x32xf32>
    %60 = arith.maximumf %58, %59 : vector<55x32xf32>
    %c0_36 = arith.constant 0 : index
    %c0_37 = arith.constant 0 : index
    %61 = vector.load %arg7[%c0_36, %c0_37] : memref<55x32xf32, #tpu.memory_space<vmem>>, vector<55x32xf32>
    tpu.vector_store %arg7[%c0_36, %c0_37], %60 {strides = array<i32>} : memref<55x32xf32, #tpu.memory_space<vmem>>, vector<55x32xf32>,
    %c0_38 = arith.constant 0 : index
    %c0_39 = arith.constant 0 : index
    %c0_40 = arith.constant 0 : index
    %62 = vector.load %arg4[%c0_38, %c0_39, %c0_40] : memref<9x32x32xf32, #tpu.memory_space<vmem>>, vector<9x32x32xf32>
    %cst_41 = arith.constant 0.000000e+00 : f32
    %63 = vector.broadcast %cst_41 : f32 to vector<37x32xf32>
    %c0_42 = arith.constant 0 : index
    %c0_43 = arith.constant 0 : index
    %64 = vector.load %arg7[%c0_42, %c0_43] : memref<55x32xf32, #tpu.memory_space<vmem>>, vector<37x32xf32>
    %65 = vector.extract_strided_slice %62 {offsets = [0, 0, 0], sizes = [1, 32, 32], strides = [1, 1, 1]} : vector<9x32x32xf32> to vector<1x32x32xf32>
    %66 = vector.shape_cast %65 : vector<1x32x32xf32> to vector<32x32xf32>
    %cst_44 = arith.constant dense<0.000000e+00> : vector<37x32xf32>
    %67 = tpu.matmul %64, %66, %cst_44 {dimension_numbers = #tpu.dot_dimension_numbers<[1], [0], [0], [1], [0, 0, 1, 1], [], []>} : vector<37x32xf32>, vector<32x32xf32>, vector<37x32xf32> -> vector<37x32xf32>
    %68 = arith.addf %63, %67 : vector<37x32xf32>
    %c1_45 = arith.constant 1 : index
    %c0_46 = arith.constant 0 : index
    %69 = vector.load %arg7[%c1_45, %c0_46] : memref<55x32xf32, #tpu.memory_space<vmem>>, vector<37x32xf32>
    %70 = vector.extract_strided_slice %62 {offsets = [1, 0, 0], sizes = [1, 32, 32], strides = [1, 1, 1]} : vector<9x32x32xf32> to vector<1x32x32xf32>
    %71 = vector.shape_cast %70 : vector<1x32x32xf32> to vector<32x32xf32>
    %cst_47 = arith.constant dense<0.000000e+00> : vector<37x32xf32>
    %72 = tpu.matmul %69, %71, %cst_47 {dimension_numbers = #tpu.dot_dimension_numbers<[1], [0], [0], [1], [0, 0, 1, 1], [], []>} : vector<37x32xf32>, vector<32x32xf32>, vector<37x32xf32> -> vector<37x32xf32>
    %73 = arith.addf %68, %72 : vector<37x32xf32>
    %c2_48 = arith.constant 2 : index
    %c0_49 = arith.constant 0 : index
    %74 = vector.load %arg7[%c2_48, %c0_49] : memref<55x32xf32, #tpu.memory_space<vmem>>, vector<37x32xf32>
    %75 = vector.extract_strided_slice %62 {offsets = [2, 0, 0], sizes = [1, 32, 32], strides = [1, 1, 1]} : vector<9x32x32xf32> to vector<1x32x32xf32>
    %76 = vector.shape_cast %75 : vector<1x32x32xf32> to vector<32x32xf32>
    %cst_50 = arith.constant dense<0.000000e+00> : vector<37x32xf32>
    %77 = tpu.matmul %74, %76, %cst_50 {dimension_numbers = #tpu.dot_dimension_numbers<[1], [0], [0], [1], [0, 0, 1, 1], [], []>} : vector<37x32xf32>, vector<32x32xf32>, vector<37x32xf32> -> vector<37x32xf32>
    %78 = arith.addf %73, %77 : vector<37x32xf32>
    %c8_51 = arith.constant 8 : index
    %c0_52 = arith.constant 0 : index
    %79 = vector.load %arg7[%c8_51, %c0_52] : memref<55x32xf32, #tpu.memory_space<vmem>>, vector<37x32xf32>
    %80 = vector.extract_strided_slice %62 {offsets = [3, 0, 0], sizes = [1, 32, 32], strides = [1, 1, 1]} : vector<9x32x32xf32> to vector<1x32x32xf32>
    %81 = vector.shape_cast %80 : vector<1x32x32xf32> to vector<32x32xf32>
    %cst_53 = arith.constant dense<0.000000e+00> : vector<37x32xf32>
    %82 = tpu.matmul %79, %81, %cst_53 {dimension_numbers = #tpu.dot_dimension_numbers<[1], [0], [0], [1], [0, 0, 1, 1], [], []>} : vector<37x32xf32>, vector<32x32xf32>, vector<37x32xf32> -> vector<37x32xf32>
    %83 = arith.addf %78, %82 : vector<37x32xf32>
    %c9_54 = arith.constant 9 : index
    %c0_55 = arith.constant 0 : index
    %84 = vector.load %arg7[%c9_54, %c0_55] : memref<55x32xf32, #tpu.memory_space<vmem>>, vector<37x32xf32>
    %85 = vector.extract_strided_slice %62 {offsets = [4, 0, 0], sizes = [1, 32, 32], strides = [1, 1, 1]} : vector<9x32x32xf32> to vector<1x32x32xf32>
    %86 = vector.shape_cast %85 : vector<1x32x32xf32> to vector<32x32xf32>
    %cst_56 = arith.constant dense<0.000000e+00> : vector<37x32xf32>
    %87 = tpu.matmul %84, %86, %cst_56 {dimension_numbers = #tpu.dot_dimension_numbers<[1], [0], [0], [1], [0, 0, 1, 1], [], []>} : vector<37x32xf32>, vector<32x32xf32>, vector<37x32xf32> -> vector<37x32xf32>
    %88 = arith.addf %83, %87 : vector<37x32xf32>
    %c10 = arith.constant 10 : index
    %c0_57 = arith.constant 0 : index
    %89 = vector.load %arg7[%c10, %c0_57] : memref<55x32xf32, #tpu.memory_space<vmem>>, vector<37x32xf32>
    %90 = vector.extract_strided_slice %62 {offsets = [5, 0, 0], sizes = [1, 32, 32], strides = [1, 1, 1]} : vector<9x32x32xf32> to vector<1x32x32xf32>
    %91 = vector.shape_cast %90 : vector<1x32x32xf32> to vector<32x32xf32>
    %cst_58 = arith.constant dense<0.000000e+00> : vector<37x32xf32>
    %92 = tpu.matmul %89, %91, %cst_58 {dimension_numbers = #tpu.dot_dimension_numbers<[1], [0], [0], [1], [0, 0, 1, 1], [], []>} : vector<37x32xf32>, vector<32x32xf32>, vector<37x32xf32> -> vector<37x32xf32>
    %93 = arith.addf %88, %92 : vector<37x32xf32>
    %c16 = arith.constant 16 : index
    %c0_59 = arith.constant 0 : index
    %94 = vector.load %arg7[%c16, %c0_59] : memref<55x32xf32, #tpu.memory_space<vmem>>, vector<37x32xf32>
    %95 = vector.extract_strided_slice %62 {offsets = [6, 0, 0], sizes = [1, 32, 32], strides = [1, 1, 1]} : vector<9x32x32xf32> to vector<1x32x32xf32>
    %96 = vector.shape_cast %95 : vector<1x32x32xf32> to vector<32x32xf32>
    %cst_60 = arith.constant dense<0.000000e+00> : vector<37x32xf32>
    %97 = tpu.matmul %94, %96, %cst_60 {dimension_numbers = #tpu.dot_dimension_numbers<[1], [0], [0], [1], [0, 0, 1, 1], [], []>} : vector<37x32xf32>, vector<32x32xf32>, vector<37x32xf32> -> vector<37x32xf32>
    %98 = arith.addf %93, %97 : vector<37x32xf32>
    %c17 = arith.constant 17 : index
    %c0_61 = arith.constant 0 : index
    %99 = vector.load %arg7[%c17, %c0_61] : memref<55x32xf32, #tpu.memory_space<vmem>>, vector<37x32xf32>
    %100 = vector.extract_strided_slice %62 {offsets = [7, 0, 0], sizes = [1, 32, 32], strides = [1, 1, 1]} : vector<9x32x32xf32> to vector<1x32x32xf32>
    %101 = vector.shape_cast %100 : vector<1x32x32xf32> to vector<32x32xf32>
    %cst_62 = arith.constant dense<0.000000e+00> : vector<37x32xf32>
    %102 = tpu.matmul %99, %101, %cst_62 {dimension_numbers = #tpu.dot_dimension_numbers<[1], [0], [0], [1], [0, 0, 1, 1], [], []>} : vector<37x32xf32>, vector<32x32xf32>, vector<37x32xf32> -> vector<37x32xf32>
    %103 = arith.addf %98, %102 : vector<37x32xf32>
    %c18 = arith.constant 18 : index
    %c0_63 = arith.constant 0 : index
    %104 = vector.load %arg7[%c18, %c0_63] : memref<55x32xf32, #tpu.memory_space<vmem>>, vector<37x32xf32>
    %105 = vector.extract_strided_slice %62 {offsets = [8, 0, 0], sizes = [1, 32, 32], strides = [1, 1, 1]} : vector<9x32x32xf32> to vector<1x32x32xf32>
    %106 = vector.shape_cast %105 : vector<1x32x32xf32> to vector<32x32xf32>
    %cst_64 = arith.constant dense<0.000000e+00> : vector<37x32xf32>
    %107 = tpu.matmul %104, %106, %cst_64 {dimension_numbers = #tpu.dot_dimension_numbers<[1], [0], [0], [1], [0, 0, 1, 1], [], []>} : vector<37x32xf32>, vector<32x32xf32>, vector<37x32xf32> -> vector<37x32xf32>
    %108 = arith.addf %103, %107 : vector<37x32xf32>
    %c0_65 = arith.constant 0 : index
    %c0_66 = arith.constant 0 : index
    %109 = vector.load %arg5[%c0_65, %c0_66] : memref<1x32xf32, #tpu.memory_space<vmem>>, vector<1x32xf32>
    %110 = vector.broadcast %109 : vector<1x32xf32> to vector<37x32xf32>
    %111 = arith.addf %108, %110 : vector<37x32xf32>
    %112 = vector.shape_cast %111 : vector<37x32xf32> to vector<1x37x32xf32>
    %c0_67 = arith.constant 0 : index
    %c0_68 = arith.constant 0 : index
    %c0_69 = arith.constant 0 : index
    %113 = vector.load %arg6[%c0_67, %c0_68, %c0_69] : memref<1x37x32xf32, #tpu.memory_space<vmem>>, vector<1x37x32xf32>
    tpu.vector_store %arg6[%c0_67, %c0_68, %c0_69], %112 {strides = array<i32>} : memref<1x37x32xf32, #tpu.memory_space<vmem>>, vector<1x37x32xf32>,
    return
  }
  func.func @transform_0(%arg0: i32) -> (i32, i32, i32) {
    %c0_i32 = arith.constant 0 : i32
    %c0_i32_0 = arith.constant 0 : i32
    %c0_i32_1 = arith.constant 0 : i32
    return %arg0, %c0_i32, %c0_i32_0 : i32, i32, i32
  }
  func.func @transform_1(%arg0: i32) -> (i32, i32, i32) {
    %c0_i32 = arith.constant 0 : i32
    %c0_i32_0 = arith.constant 0 : i32
    %c0_i32_1 = arith.constant 0 : i32
    %c0_i32_2 = arith.constant 0 : i32
    return %c0_i32, %c0_i32_0, %c0_i32_1 : i32, i32, i32
  }
  func.func @transform_2(%arg0: i32) -> (i32, i32) {
    %c0_i32 = arith.constant 0 : i32
    %c0_i32_0 = arith.constant 0 : i32
    %c0_i32_1 = arith.constant 0 : i32
    return %c0_i32, %c0_i32_0 : i32, i32
  }
  func.func @transform_3(%arg0: i32) -> (i32, i32, i32) {
    %c0_i32 = arith.constant 0 : i32
    %c0_i32_0 = arith.constant 0 : i32
    %c0_i32_1 = arith.constant 0 : i32
    %c0_i32_2 = arith.constant 0 : i32
    return %c0_i32, %c0_i32_0, %c0_i32_1 : i32, i32, i32
  }
  func.func @transform_4(%arg0: i32) -> (i32, i32) {
    %c0_i32 = arith.constant 0 : i32
    %c0_i32_0 = arith.constant 0 : i32
    %c0_i32_1 = arith.constant 0 : i32
    return %c0_i32, %c0_i32_0 : i32, i32
  }
  func.func @transform_5(%arg0: i32) -> (i32, i32, i32) {
    %c0_i32 = arith.constant 0 : i32
    %c0_i32_0 = arith.constant 0 : i32
    %c0_i32_1 = arith.constant 0 : i32
    return %arg0, %c0_i32, %c0_i32_0 : i32, i32, i32
  }
}

module attributes {stable_mosaic.version = 11 : i64} {
  func.func @kernel(%arg0: i32, %arg1: memref<2x1184xf32, #tpu.memory_space<vmem>>, %arg2: memref<1184x32xf32, #tpu.memory_space<vmem>>, %arg3: memref<1x32xf32, #tpu.memory_space<vmem>>, %arg4: memref<1x32xf32, #tpu.memory_space<vmem>>, %arg5: memref<1x32xf32, #tpu.memory_space<vmem>>, %arg6: memref<32x32xf32, #tpu.memory_space<vmem>>, %arg7: memref<1x32xf32, #tpu.memory_space<vmem>>, %arg8: memref<1x32xf32, #tpu.memory_space<vmem>>, %arg9: memref<1x32xf32, #tpu.memory_space<vmem>>, %arg10: memref<1x32xf32, #tpu.memory_space<vmem>>, %arg11: memref<1x1xf32, #tpu.memory_space<vmem>>, %arg12: memref<2x1xf32, #tpu.memory_space<vmem>>) attributes {dimension_semantics = [#tpu.dimension_semantics<parallel>], iteration_bounds = array<i64: 1>, scalar_prefetch = 0 : i64, scratch_operands = 0 : i64, tpu.core_type = #tpu.core_type<tc>, window_params = [{transform_indices = @transform_0, window_bounds = array<i64: 2, 1184>}, {pipeline_mode = #tpu.pipeline_mode<synchronous>, transform_indices = @transform_1, window_bounds = array<i64: 1184, 32>}, {pipeline_mode = #tpu.pipeline_mode<synchronous>, transform_indices = @transform_2, window_bounds = array<i64: 1, 32>}, {pipeline_mode = #tpu.pipeline_mode<synchronous>, transform_indices = @transform_3, window_bounds = array<i64: 1, 32>}, {pipeline_mode = #tpu.pipeline_mode<synchronous>, transform_indices = @transform_4, window_bounds = array<i64: 1, 32>}, {pipeline_mode = #tpu.pipeline_mode<synchronous>, transform_indices = @transform_5, window_bounds = array<i64: 32, 32>}, {pipeline_mode = #tpu.pipeline_mode<synchronous>, transform_indices = @transform_6, window_bounds = array<i64: 1, 32>}, {pipeline_mode = #tpu.pipeline_mode<synchronous>, transform_indices = @transform_7, window_bounds = array<i64: 1, 32>}, {pipeline_mode = #tpu.pipeline_mode<synchronous>, transform_indices = @transform_8, window_bounds = array<i64: 1, 32>}, {pipeline_mode = #tpu.pipeline_mode<synchronous>, transform_indices = @transform_9, window_bounds = array<i64: 1, 32>}, {pipeline_mode = #tpu.pipeline_mode<synchronous>, transform_indices = @transform_10, window_bounds = array<i64: 1, 1>}, {transform_indices = @transform_11, window_bounds = array<i64: 2, 1>}]} {
    %c0 = arith.constant 0 : index
    %c0_0 = arith.constant 0 : index
    %0 = vector.load %arg1[%c0, %c0_0] : memref<2x1184xf32, #tpu.memory_space<vmem>>, vector<2x1184xf32>
    %c0_1 = arith.constant 0 : index
    %c0_2 = arith.constant 0 : index
    %1 = vector.load %arg2[%c0_1, %c0_2] : memref<1184x32xf32, #tpu.memory_space<vmem>>, vector<1184x32xf32>
    %c0_3 = arith.constant 0 : index
    %c0_4 = arith.constant 0 : index
    %2 = vector.load %arg3[%c0_3, %c0_4] : memref<1x32xf32, #tpu.memory_space<vmem>>, vector<1x32xf32>
    %c0_5 = arith.constant 0 : index
    %c0_6 = arith.constant 0 : index
    %3 = vector.load %arg4[%c0_5, %c0_6] : memref<1x32xf32, #tpu.memory_space<vmem>>, vector<1x32xf32>
    %c0_7 = arith.constant 0 : index
    %c0_8 = arith.constant 0 : index
    %4 = vector.load %arg5[%c0_7, %c0_8] : memref<1x32xf32, #tpu.memory_space<vmem>>, vector<1x32xf32>
    %cst = arith.constant dense<0.000000e+00> : vector<2x32xf32>
    %5 = tpu.matmul %0, %1, %cst {dimension_numbers = #tpu.dot_dimension_numbers<[1], [0], [0], [1], [0, 0, 1, 1], [], []>} : vector<2x1184xf32>, vector<1184x32xf32>, vector<2x32xf32> -> vector<2x32xf32>
    %6 = vector.broadcast %2 : vector<1x32xf32> to vector<2x32xf32>
    %7 = arith.addf %5, %6 : vector<2x32xf32>
    %cst_9 = arith.constant dense<0.000000e+00> : vector<2xf32>
    %8 = vector.multi_reduction <add>, %7, %cst_9 [1] : vector<2x32xf32> to vector<2xf32>
    %9 = vector.shape_cast %8 : vector<2xf32> to vector<2x1xf32>
    %cst_10 = arith.constant 3.125000e-02 : f32
    %10 = vector.broadcast %cst_10 : f32 to vector<2x1xf32>
    %11 = arith.mulf %9, %10 : vector<2x1xf32>
    %12 = arith.mulf %7, %7 : vector<2x32xf32>
    %cst_11 = arith.constant dense<0.000000e+00> : vector<2xf32>
    %13 = vector.multi_reduction <add>, %12, %cst_11 [1] : vector<2x32xf32> to vector<2xf32>
    %14 = vector.shape_cast %13 : vector<2xf32> to vector<2x1xf32>
    %cst_12 = arith.constant 3.125000e-02 : f32
    %15 = vector.broadcast %cst_12 : f32 to vector<2x1xf32>
    %16 = arith.mulf %14, %15 : vector<2x1xf32>
    %17 = vector.broadcast %11 : vector<2x1xf32> to vector<2x32xf32>
    %18 = arith.subf %7, %17 : vector<2x32xf32>
    %19 = arith.mulf %11, %11 : vector<2x1xf32>
    %20 = arith.subf %16, %19 : vector<2x1xf32>
    %cst_13 = arith.constant 9.99999974E-6 : f32
    %21 = vector.broadcast %cst_13 : f32 to vector<2x1xf32>
    %22 = arith.addf %20, %21 : vector<2x1xf32>
    %23 = math.rsqrt %22 : vector<2x1xf32>
    %24 = vector.broadcast %23 : vector<2x1xf32> to vector<2x32xf32>
    %25 = arith.mulf %18, %24 : vector<2x32xf32>
    %26 = vector.broadcast %3 : vector<1x32xf32> to vector<2x32xf32>
    %27 = arith.mulf %25, %26 : vector<2x32xf32>
    %28 = vector.broadcast %4 : vector<1x32xf32> to vector<2x32xf32>
    %29 = arith.addf %27, %28 : vector<2x32xf32>
    %cst_14 = arith.constant 0.000000e+00 : f32
    %30 = vector.broadcast %cst_14 : f32 to vector<2x32xf32>
    %31 = arith.maximumf %29, %30 : vector<2x32xf32>
    %c0_15 = arith.constant 0 : index
    %c0_16 = arith.constant 0 : index
    %32 = vector.load %arg6[%c0_15, %c0_16] : memref<32x32xf32, #tpu.memory_space<vmem>>, vector<32x32xf32>
    %c0_17 = arith.constant 0 : index
    %c0_18 = arith.constant 0 : index
    %33 = vector.load %arg7[%c0_17, %c0_18] : memref<1x32xf32, #tpu.memory_space<vmem>>, vector<1x32xf32>
    %c0_19 = arith.constant 0 : index
    %c0_20 = arith.constant 0 : index
    %34 = vector.load %arg8[%c0_19, %c0_20] : memref<1x32xf32, #tpu.memory_space<vmem>>, vector<1x32xf32>
    %c0_21 = arith.constant 0 : index
    %c0_22 = arith.constant 0 : index
    %35 = vector.load %arg9[%c0_21, %c0_22] : memref<1x32xf32, #tpu.memory_space<vmem>>, vector<1x32xf32>
    %cst_23 = arith.constant dense<0.000000e+00> : vector<2x32xf32>
    %36 = tpu.matmul %31, %32, %cst_23 {dimension_numbers = #tpu.dot_dimension_numbers<[1], [0], [0], [1], [0, 0, 1, 1], [], []>} : vector<2x32xf32>, vector<32x32xf32>, vector<2x32xf32> -> vector<2x32xf32>
    %37 = vector.broadcast %33 : vector<1x32xf32> to vector<2x32xf32>
    %38 = arith.addf %36, %37 : vector<2x32xf32>
    %cst_24 = arith.constant dense<0.000000e+00> : vector<2xf32>
    %39 = vector.multi_reduction <add>, %38, %cst_24 [1] : vector<2x32xf32> to vector<2xf32>
    %40 = vector.shape_cast %39 : vector<2xf32> to vector<2x1xf32>
    %cst_25 = arith.constant 3.125000e-02 : f32
    %41 = vector.broadcast %cst_25 : f32 to vector<2x1xf32>
    %42 = arith.mulf %40, %41 : vector<2x1xf32>
    %43 = arith.mulf %38, %38 : vector<2x32xf32>
    %cst_26 = arith.constant dense<0.000000e+00> : vector<2xf32>
    %44 = vector.multi_reduction <add>, %43, %cst_26 [1] : vector<2x32xf32> to vector<2xf32>
    %45 = vector.shape_cast %44 : vector<2xf32> to vector<2x1xf32>
    %cst_27 = arith.constant 3.125000e-02 : f32
    %46 = vector.broadcast %cst_27 : f32 to vector<2x1xf32>
    %47 = arith.mulf %45, %46 : vector<2x1xf32>
    %48 = vector.broadcast %42 : vector<2x1xf32> to vector<2x32xf32>
    %49 = arith.subf %38, %48 : vector<2x32xf32>
    %50 = arith.mulf %42, %42 : vector<2x1xf32>
    %51 = arith.subf %47, %50 : vector<2x1xf32>
    %cst_28 = arith.constant 9.99999974E-6 : f32
    %52 = vector.broadcast %cst_28 : f32 to vector<2x1xf32>
    %53 = arith.addf %51, %52 : vector<2x1xf32>
    %54 = math.rsqrt %53 : vector<2x1xf32>
    %55 = vector.broadcast %54 : vector<2x1xf32> to vector<2x32xf32>
    %56 = arith.mulf %49, %55 : vector<2x32xf32>
    %57 = vector.broadcast %34 : vector<1x32xf32> to vector<2x32xf32>
    %58 = arith.mulf %56, %57 : vector<2x32xf32>
    %59 = vector.broadcast %35 : vector<1x32xf32> to vector<2x32xf32>
    %60 = arith.addf %58, %59 : vector<2x32xf32>
    %cst_29 = arith.constant 0.000000e+00 : f32
    %61 = vector.broadcast %cst_29 : f32 to vector<2x32xf32>
    %62 = arith.maximumf %60, %61 : vector<2x32xf32>
    %c0_30 = arith.constant 0 : index
    %c0_31 = arith.constant 0 : index
    %63 = vector.load %arg10[%c0_30, %c0_31] : memref<1x32xf32, #tpu.memory_space<vmem>>, vector<1x32xf32>
    %c0_32 = arith.constant 0 : index
    %c0_33 = arith.constant 0 : index
    %64 = vector.load %arg11[%c0_32, %c0_33] : memref<1x1xf32, #tpu.memory_space<vmem>>, vector<1x1xf32>
    %65 = vector.broadcast %63 : vector<1x32xf32> to vector<2x32xf32>
    %66 = arith.mulf %62, %65 : vector<2x32xf32>
    %cst_34 = arith.constant dense<0.000000e+00> : vector<2xf32>
    %67 = vector.multi_reduction <add>, %66, %cst_34 [1] : vector<2x32xf32> to vector<2xf32>
    %68 = vector.shape_cast %67 : vector<2xf32> to vector<2x1xf32>
    %69 = vector.broadcast %64 : vector<1x1xf32> to vector<2x1xf32>
    %70 = arith.addf %68, %69 : vector<2x1xf32>
    %cst_35 = arith.constant -1.000000e+01 : f32
    %cst_36 = arith.constant 1.000000e+01 : f32
    %71 = vector.broadcast %cst_35 : f32 to vector<2x1xf32>
    %72 = arith.maximumf %71, %70 : vector<2x1xf32>
    %73 = vector.broadcast %cst_36 : f32 to vector<2x1xf32>
    %74 = arith.minimumf %73, %72 : vector<2x1xf32>
    %c0_37 = arith.constant 0 : index
    %c0_38 = arith.constant 0 : index
    %75 = vector.load %arg12[%c0_37, %c0_38] : memref<2x1xf32, #tpu.memory_space<vmem>>, vector<2x1xf32>
    tpu.vector_store %arg12[%c0_37, %c0_38], %74 {strides = array<i32>} : memref<2x1xf32, #tpu.memory_space<vmem>>, vector<2x1xf32>,
    return
  }
  func.func @transform_0(%arg0: i32) -> (i32, i32) {
    %c0_i32 = arith.constant 0 : i32
    %c0_i32_0 = arith.constant 0 : i32
    return %arg0, %c0_i32 : i32, i32
  }
  func.func @transform_1(%arg0: i32) -> (i32, i32) {
    %c0_i32 = arith.constant 0 : i32
    %c0_i32_0 = arith.constant 0 : i32
    %c0_i32_1 = arith.constant 0 : i32
    return %c0_i32, %c0_i32_0 : i32, i32
  }
  func.func @transform_2(%arg0: i32) -> (i32, i32) {
    %c0_i32 = arith.constant 0 : i32
    %c0_i32_0 = arith.constant 0 : i32
    %c0_i32_1 = arith.constant 0 : i32
    return %c0_i32, %c0_i32_0 : i32, i32
  }
  func.func @transform_3(%arg0: i32) -> (i32, i32) {
    %c0_i32 = arith.constant 0 : i32
    %c0_i32_0 = arith.constant 0 : i32
    %c0_i32_1 = arith.constant 0 : i32
    return %c0_i32, %c0_i32_0 : i32, i32
  }
  func.func @transform_4(%arg0: i32) -> (i32, i32) {
    %c0_i32 = arith.constant 0 : i32
    %c0_i32_0 = arith.constant 0 : i32
    %c0_i32_1 = arith.constant 0 : i32
    return %c0_i32, %c0_i32_0 : i32, i32
  }
  func.func @transform_5(%arg0: i32) -> (i32, i32) {
    %c0_i32 = arith.constant 0 : i32
    %c0_i32_0 = arith.constant 0 : i32
    %c0_i32_1 = arith.constant 0 : i32
    return %c0_i32, %c0_i32_0 : i32, i32
  }
  func.func @transform_6(%arg0: i32) -> (i32, i32) {
    %c0_i32 = arith.constant 0 : i32
    %c0_i32_0 = arith.constant 0 : i32
    %c0_i32_1 = arith.constant 0 : i32
    return %c0_i32, %c0_i32_0 : i32, i32
  }
  func.func @transform_7(%arg0: i32) -> (i32, i32) {
    %c0_i32 = arith.constant 0 : i32
    %c0_i32_0 = arith.constant 0 : i32
    %c0_i32_1 = arith.constant 0 : i32
    return %c0_i32, %c0_i32_0 : i32, i32
  }
  func.func @transform_8(%arg0: i32) -> (i32, i32) {
    %c0_i32 = arith.constant 0 : i32
    %c0_i32_0 = arith.constant 0 : i32
    %c0_i32_1 = arith.constant 0 : i32
    return %c0_i32, %c0_i32_0 : i32, i32
  }
  func.func @transform_9(%arg0: i32) -> (i32, i32) {
    %c0_i32 = arith.constant 0 : i32
    %c0_i32_0 = arith.constant 0 : i32
    %c0_i32_1 = arith.constant 0 : i32
    return %c0_i32, %c0_i32_0 : i32, i32
  }
  func.func @transform_10(%arg0: i32) -> (i32, i32) {
    %c0_i32 = arith.constant 0 : i32
    %c0_i32_0 = arith.constant 0 : i32
    %c0_i32_1 = arith.constant 0 : i32
    return %c0_i32, %c0_i32_0 : i32, i32
  }
  func.func @transform_11(%arg0: i32) -> (i32, i32) {
    %c0_i32 = arith.constant 0 : i32
    %c0_i32_0 = arith.constant 0 : i32
    return %arg0, %c0_i32 : i32, i32
  }
}

</mosaic_0001>

<bundles_post_ra>
// kernel: _lambda_.3
= control target key start
LH: loop header
LB: loop body
LE: loop exit
PB: predicated region body
PF: predicated region fallthrough
CT: control target
= control target key end

     0   :  { %v958_v27 = vmov 1983009808   ;;  %v207_v29 = vlaneseq  ;;  %vm254_vm0 = vcmask 261120   ;;  %vm607_vm1 = vcmask 254976   ;;  %s1556_s1 = inlined_call_operand.vmem [shape: f32[1184,32], index: 1, kind: input, shape index: {}]   ;;  %s1557_s0 = inlined_call_operand.vmem [shape: f32[2,1184], index: 0, kind: input, shape index: {}]   ;;  %s1558_s2 = inlined_call_operand.vmem [shape: f32[1,32], index: 2, kind: input, shape index: {}]   ;;  %s1559_s5 = inlined_call_operand.vmem [shape: f32[32,32], index: 5, kind: input, shape index: {}]   ;;  %s1560_s3 = inlined_call_operand.vmem [shape: f32[1,32], index: 3, kind: input, shape index: {}, may-alias: {3,7}]   ;;  %s1561_s4 = inlined_call_operand.vmem [shape: f32[1,32], index: 4, kind: input, shape index: {}, may-alias: {4,8}]   ;;  %s1562_s6 = inlined_call_operand.vmem [shape: f32[1,32], index: 6, kind: input, shape index: {}]   ;;  %s1563_s10 = inlined_call_operand.<no memory space> [shape: f32[1,1], index: 10, kind: input, shape index: {}]   ;;  %s1564_s7 = inlined_call_operand.vmem [shape: f32[1,32], index: 7, kind: input, shape index: {}, may-alias: {3,7}]   ;;  %s1565_s8 = inlined_call_operand.vmem [shape: f32[1,32], index: 8, kind: input, shape index: {}, may-alias: {4,8}]   ;;  %s1566_s9 = inlined_call_operand.vmem [shape: f32[1,32], index: 9, kind: input, shape index: {}]   ;;  %s1567_s11 = inlined_call_operand.vmem [shape: f32[2,1], index: 11, kind: output, shape index: {}]  }
   0x1   :  { %v74_v0 = vld [vmem:[%s1556_s1 + $0xf8] sm:$0xff]  ;;  %v73_v2 = vld [vmem:[%s1556_s1 + $0xf0] sm:$0xff]  ;;  %v72_v6 = vld [vmem:[%s1556_s1 + $0xe8] sm:$0xff]  ;;  %v205_v28 = vunpack.c.l.s4 %v958_v27  ;;  %vm960_vm2 = vmmov 0   ;;  %vm775_vm3 = vcmask 1024  }
   0x2   :  { %v58_v1 = vld [vmem:[%s1556_s1 + $0x78] sm:$0xff]  ;;  %793 = vmatprep.subr.mxu0 %v74_v0  ;;  %v57_v4 = vld [vmem:[%s1556_s1 + $0x70] sm:$0xff]  ;;  %v56_v8 = vld [vmem:[%s1556_s1 + $0x68] sm:$0xff]  ;;  %v208_v39 = vshrl.u32 %v207_v29, 7 }
   0x3   :  { %v106_v3 = vld [vmem:[%s1556_s1 + $0x1f8] sm:$0xff]  ;;  %794 = vmatpush3.msra.mxu0 %v58_v1  ;;  %v105_v7 = vld [vmem:[%s1556_s1 + $0x1f0] sm:$0xff]  ;;  %v104_v10 = vld [vmem:[%s1556_s1 + $0x1e8] sm:$0xff]  ;;  %v206_v38 = vunpack.c.0.s8 %v205_v28 }
   0x4   :  { %v90_v5 = vld [vmem:[%s1556_s1 + $0x178] sm:$0xff]  ;;  %828 = vmatprep.subr.mxu1 %v106_v3  ;;  %795 = vmatprep.subr.mxu0 %v73_v2  ;;  %v89_v9 = vld [vmem:[%s1556_s1 + $0x170] sm:$0xff]  ;;  %v71_v11 = vld [vmem:[%s1556_s1 + $0xe0] sm:$0xff] }
   0x5   :  { %829 = vmatpush3.msra.mxu1 %v90_v5  ;;  %796 = vmatpush3.msra.mxu0 %v57_v4  ;;  %v88_v12 = vld [vmem:[%s1556_s1 + $0x168] sm:$0xff]  ;;  %v55_v13 = vld [vmem:[%s1556_s1 + $0x60] sm:$0xff]  ;;  %v70_v15 = vld [vmem:[%s1556_s1 + $0xd8] sm:$0xff]  ;;  %v1150_v48 = vsub.s32 %v206_v38, %v208_v39 }
   0x6   :  { %830 = vmatprep.subr.mxu1 %v105_v7  ;;  %797 = vmatprep.subr.mxu0 %v72_v6  ;;  %v103_v14 = vld [vmem:[%s1556_s1 + $0x1e0] sm:$0xff]  ;;  %v54_v17 = vld [vmem:[%s1556_s1 + $0x58] sm:$0xff]  ;;  %v69_v19 = vld [vmem:[%s1556_s1 + $0xd0] sm:$0xff] }
   0x7   :  { %831 = vmatpush3.msra.mxu1 %v89_v9  ;;  %798 = vmatpush3.msra.mxu0 %v56_v8  ;;  %v87_v16 = vld [vmem:[%s1556_s1 + $0x160] sm:$0xff]  ;;  %v102_v18 = vld [vmem:[%s1556_s1 + $0x1d8] sm:$0xff]  ;;  %v53_v21 = vld [vmem:[%s1556_s1 + $0x50] sm:$0xff] }
   0x8   :  { %832 = vmatprep.subr.mxu1 %v104_v10  ;;  %799 = vmatprep.subr.mxu0 %v71_v11  ;;  %v86_v20 = vld [vmem:[%s1556_s1 + $0x158] sm:$0xff]  ;;  %v101_v22 = vld [vmem:[%s1556_s1 + $0x1d0] sm:$0xff]  ;;  %v68_v23 = vld [vmem:[%s1556_s1 + $0xc8] sm:$0xff] }
   0x9   :  { %833 = vmatpush3.msra.mxu1 %v88_v12  ;;  %800 = vmatpush3.msra.mxu0 %v55_v13  ;;  %v85_v24 = vld [vmem:[%s1556_s1 + $0x150] sm:$0xff]  ;;  %v52_v25 = vld [vmem:[%s1556_s1 + $0x48] sm:$0xff]  ;;  %v67_v30 = vld [vmem:[%s1556_s1 + $0xc0] sm:$0xff] }
   0xa   :  { %834 = vmatprep.subr.mxu1 %v103_v14  ;;  %801 = vmatprep.subr.mxu0 %v70_v15  ;;  %v100_v26 = vld [vmem:[%s1556_s1 + $0x1c8] sm:$0xff]  ;;  %v51_v32 = vld [vmem:[%s1556_s1 + $0x40] sm:$0xff]  ;;  %v66_v34 = vld [vmem:[%s1556_s1 + $0xb8] sm:$0xff] }
   0xb   :  { %835 = vmatpush3.msra.mxu1 %v87_v16  ;;  %802 = vmatpush3.msra.mxu0 %v54_v17  ;;  %v84_v31 = vld [vmem:[%s1556_s1 + $0x148] sm:$0xff]  ;;  %v99_v33 = vld [vmem:[%s1556_s1 + $0x1c0] sm:$0xff]  ;;  %v50_v36 = vld [vmem:[%s1556_s1 + $0x38] sm:$0xff] }
   0xc   :  { %836 = vmatprep.subr.mxu1 %v102_v18  ;;  %803 = vmatprep.subr.mxu0 %v69_v19  ;;  %v83_v35 = vld [vmem:[%s1556_s1 + $0x140] sm:$0xff]  ;;  %v98_v37 = vld [vmem:[%s1556_s1 + $0x1b8] sm:$0xff]  ;;  %v65_v40 = vld [vmem:[%s1556_s1 + $0xb0] sm:$0xff] }
   0xd   :  { %837 = vmatpush3.msra.mxu1 %v86_v20  ;;  %804 = vmatpush3.msra.mxu0 %v53_v21  ;;  %v82_v41 = vld [vmem:[%s1556_s1 + $0x138] sm:$0xff]  ;;  %v49_v42 = vld [vmem:[%s1556_s1 + $0x30] sm:$0xff]  ;;  %v64_v44 = vld [vmem:[%s1556_s1 + $0xa8] sm:$0xff] }
   0xe   :  { %838 = vmatprep.subr.mxu1 %v101_v22  ;;  %805 = vmatprep.subr.mxu0 %v68_v23  ;;  %v97_v43 = vld [vmem:[%s1556_s1 + $0x1b0] sm:$0xff]  ;;  %v48_v46 = vld [vmem:[%s1556_s1 + $0x28] sm:$0xff]  ;;  %v63_v49 = vld [vmem:[%s1556_s1 + $0xa0] sm:$0xff] }
   0xf   :  { %839 = vmatpush3.msra.mxu1 %v85_v24  ;;  %806 = vmatpush3.msra.mxu0 %v52_v25  ;;  %v81_v45 = vld [vmem:[%s1556_s1 + $0x130] sm:$0xff]  ;;  %v96_v47 = vld [vmem:[%s1556_s1 + $0x1a8] sm:$0xff]  ;;  %v40_v51 = vld [vmem:[%s1557_s0] sm:$0xff] }
  0x10   :  { %840 = vmatprep.subr.mxu1 %v100_v26  ;;  %807 = vmatprep.subr.mxu0 %v67_v30  ;;  %v80_v50 = vld [vmem:[%s1556_s1 + $0x128] sm:$0xff]  ;;  %v47_v52 = vld [vmem:[%s1556_s1 + $0x20] sm:$0xff]  ;;  %v62_v54 = vld [vmem:[%s1556_s1 + $0x98] sm:$0xff]  ;;  %v210_v58 = vrot.slane %v40_v51, %v1150_v48  ;;  %v203_v59 = vcombine.high %v40_v51, %v40_v51 }
  0x11   :  { %841 = vmatpush3.msra.mxu1 %v84_v31  ;;  %808 = vmatpush3.msra.mxu0 %v51_v32  ;;  %v95_v53 = vld [vmem:[%s1556_s1 + $0x1a0] sm:$0xff]  ;;  %v46_v56 = vld [vmem:[%s1556_s1 + $0x18] sm:$0xff]  ;;  %v61_v60 = vld [vmem:[%s1556_s1 + $0x90] sm:$0xff] }
  0x12   :  { %842 = vmatprep.subr.mxu1 %v99_v33  ;;  %809 = vmatprep.subr.mxu0 %v66_v34  ;;  %v79_v55 = vld [vmem:[%s1556_s1 + $0x120] sm:$0xff]  ;;  %v94_v57 = vld [vmem:[%s1556_s1 + $0x198] sm:$0xff]  ;;  %v45_v62 = vld [vmem:[%s1556_s1 + $0x10] sm:$0xff]  ;;  %v218_v4 = vcombine.high %v210_v58, %v210_v58  ;;  %v217_v5 = vrot.slane %v203_v59, %v1150_v48 }
  0x13   :  { %843 = vmatpush3.msra.mxu1 %v83_v35  ;;  %810 = vmatpush3.msra.mxu0 %v50_v36  ;;  %v78_v61 = vld [vmem:[%s1556_s1 + $0x118] sm:$0xff]  ;;  %v93_v63 = vld [vmem:[%s1556_s1 + $0x190] sm:$0xff]  ;;  %v60_v0 = vld [vmem:[%s1556_s1 + $0x88] sm:$0xff] }
  0x14   :  { %844 = vmatprep.subr.mxu1 %v98_v37  ;;  %811 = vmatprep.subr.mxu0 %v65_v40  ;;  %v77_v1 = vld [vmem:[%s1556_s1 + $0x110] sm:$0xff]  ;;  %v44_v2 = vld [vmem:[%s1556_s1 + $0x8] sm:$0xff]  ;;  %v59_v6 = vld [vmem:[%s1556_s1 + $0x80] sm:$0xff]  ;;  %v219_v12 = vcombine.high %v217_v5, %v217_v5 }
  0x15   :  { %845 = vmatpush3.msra.mxu1 %v82_v41  ;;  %812 = vmatpush3.msra.mxu0 %v49_v42  ;;  %v92_v3 = vld [vmem:[%s1556_s1 + $0x188] sm:$0xff]  ;;  %v43_v7 = vld [vmem:[%s1556_s1] sm:$0xff]  ;;  %v138_v10 = vld [vmem:[%s1556_s1 + $0x2f8] sm:$0xff] }
  0x16   :  { %846 = vmatprep.subr.mxu1 %v97_v43  ;;  %813 = vmatprep.subr.mxu0 %v64_v44  ;;  %v76_v8 = vld [vmem:[%s1556_s1 + $0x108] sm:$0xff]  ;;  %v91_v9 = vld [vmem:[%s1556_s1 + $0x180] sm:$0xff]  ;;  %v122_v13 = vld [vmem:[%s1556_s1 + $0x278] sm:$0xff] }
  0x17   :  { %847 = vmatpush3.msra.mxu1 %v81_v45  ;;  %814 = vmatpush3.msra.mxu0 %v48_v46  ;;  %v75_v11 = vld [vmem:[%s1556_s1 + $0x100] sm:$0xff]  ;;  %v137_v14 = vld [vmem:[%s1556_s1 + $0x2f0] sm:$0xff]  ;;  %v170_v15 = vld [vmem:[%s1556_s1 + $0x3f8] sm:$0xff] }
  0x18   :  { %848 = vmatprep.subr.mxu1 %v96_v47  ;;  %815 = vmatprep.subr.mxu0 %v63_v49  ;;  %v121_v16 = vld [vmem:[%s1556_s1 + $0x270] sm:$0xff]  ;;  %v154_v17 = vld [vmem:[%s1556_s1 + $0x378] sm:$0xff]  ;;  %v136_v18 = vld [vmem:[%s1556_s1 + $0x2e8] sm:$0xff] }
  0x19   :  { %849 = vmatpush3.msra.mxu1 %v80_v50  ;;  %816 = vmatpush3.msra.mxu0 %v47_v52  ;;  %v169_v19 = vld [vmem:[%s1556_s1 + $0x3f0] sm:$0xff]  ;;  %v120_v20 = vld [vmem:[%s1556_s1 + $0x268] sm:$0xff]  ;;  %v135_v22 = vld [vmem:[%s1556_s1 + $0x2e0] sm:$0xff] }
  0x1a   :  { %850 = vmatprep.subr.mxu1 %v95_v53  ;;  %817 = vmatprep.subr.mxu0 %v62_v54  ;;  %v153_v21 = vld [vmem:[%s1556_s1 + $0x370] sm:$0xff]  ;;  %v168_v23 = vld [vmem:[%s1556_s1 + $0x3e8] sm:$0xff]  ;;  %v119_v24 = vld [vmem:[%s1556_s1 + $0x260] sm:$0xff] }
  0x1b   :  { %851 = vmatpush3.msra.mxu1 %v79_v55  ;;  %818 = vmatpush3.msra.mxu0 %v46_v56  ;;  %v152_v25 = vld [vmem:[%s1556_s1 + $0x368] sm:$0xff]  ;;  %v134_v26 = vld [vmem:[%s1556_s1 + $0x2d8] sm:$0xff]  ;;  %v167_v27 = vld [vmem:[%s1556_s1 + $0x3e0] sm:$0xff] }
  0x1c   :  { %852 = vmatprep.subr.mxu1 %v94_v57  ;;  %819 = vmatprep.subr.mxu0 %v61_v60  ;;  %v118_v28 = vld [vmem:[%s1556_s1 + $0x258] sm:$0xff]  ;;  %v151_v29 = vld [vmem:[%s1556_s1 + $0x360] sm:$0xff]  ;;  %v133_v30 = vld [vmem:[%s1556_s1 + $0x2d0] sm:$0xff] }
  0x1d   :  { %853 = vmatpush3.msra.mxu1 %v78_v61  ;;  %820 = vmatpush3.msra.mxu0 %v45_v62  ;;  %v166_v31 = vld [vmem:[%s1556_s1 + $0x3d8] sm:$0xff]  ;;  %v117_v32 = vld [vmem:[%s1556_s1 + $0x250] sm:$0xff]  ;;  %v132_v34 = vld [vmem:[%s1556_s1 + $0x2c8] sm:$0xff] }
  0x1e   :  { %854 = vmatprep.subr.mxu1 %v93_v63  ;;  %821 = vmatprep.subr.mxu0 %v60_v0  ;;  %v150_v33 = vld [vmem:[%s1556_s1 + $0x358] sm:$0xff]  ;;  %v165_v35 = vld [vmem:[%s1556_s1 + $0x3d0] sm:$0xff]  ;;  %v116_v36 = vld [vmem:[%s1556_s1 + $0x248] sm:$0xff] }
  0x1f   :  { %855 = vmatpush3.msra.mxu1 %v77_v1  ;;  %822 = vmatpush3.msra.mxu0 %v44_v2  ;;  %v149_v37 = vld [vmem:[%s1556_s1 + $0x350] sm:$0xff]  ;;  %v131_v38 = vld [vmem:[%s1556_s1 + $0x2c0] sm:$0xff]  ;;  %v164_v39 = vld [vmem:[%s1556_s1 + $0x3c8] sm:$0xff] }
  0x20   :  { %856 = vmatprep.subr.mxu1 %v92_v3  ;;  %823 = vmatprep.subr.mxu0 %v59_v6  ;;  %v115_v40 = vld [vmem:[%s1556_s1 + $0x240] sm:$0xff]  ;;  %v148_v41 = vld [vmem:[%s1556_s1 + $0x348] sm:$0xff]  ;;  %v130_v42 = vld [vmem:[%s1556_s1 + $0x2b8] sm:$0xff] }
  0x21   :  { %321 = vmatprep.mubr.f32.mxu0 %v218_v4  ;;  %824 = vmatpush3.msra.mxu0 %v43_v7  ;;  %v163_v43 = vld [vmem:[%s1556_s1 + $0x3c0] sm:$0xff]  ;;  %v114_v44 = vld [vmem:[%s1556_s1 + $0x238] sm:$0xff]  ;;  %v129_v46 = vld [vmem:[%s1556_s1 + $0x2b0] sm:$0xff] }
  0x22   :  { %857 = vmatpush3.msra.mxu1 %v76_v8  ;;  %322 = vmatmul.mubr.f32.vlgmr.msra.gmra.mxu0 %v210_v58  ;;  %v147_v45 = vld [vmem:[%s1556_s1 + $0x340] sm:$0xff]  ;;  %v162_v47 = vld [vmem:[%s1556_s1 + $0x3b8] sm:$0xff]  ;;  %v113_v49 = vld [vmem:[%s1556_s1 + $0x230] sm:$0xff] }
  0x23   :  { %858 = vmatprep.subr.mxu1 %v91_v9  ;;  %863 = vmatprep.subr.mxu0 %v138_v10  ;;  %v146_v50 = vld [vmem:[%s1556_s1 + $0x338] sm:$0xff]  ;;  %v128_v51 = vld [vmem:[%s1556_s1 + $0x2a8] sm:$0xff]  ;;  %v161_v52 = vld [vmem:[%s1556_s1 + $0x3b0] sm:$0xff] }
  0x24   :  { %859 = vmatpush3.msra.mxu1 %v75_v11  ;;  %391 = vmatprep.mubr.f32.mxu1 %v219_v12  ;;  %v112_v53 = vld [vmem:[%s1556_s1 + $0x228] sm:$0xff]  ;;  %v145_v54 = vld [vmem:[%s1556_s1 + $0x330] sm:$0xff]  ;;  %v127_v55 = vld [vmem:[%s1556_s1 + $0x2a0] sm:$0xff] }
  0x25   :  { %864 = vmatpush3.msra.mxu0 %v122_v13  ;;  %392 = vmatmul.mubr.f32.vlgmr.msra.gmra.mxu1 %v217_v5  ;;  %v160_v56 = vld [vmem:[%s1556_s1 + $0x3a8] sm:$0xff]  ;;  %v111_v57 = vld [vmem:[%s1556_s1 + $0x220] sm:$0xff]  ;;  %v126_v60 = vld [vmem:[%s1556_s1 + $0x298] sm:$0xff] }
  0x26   :  { %865 = vmatprep.subr.mxu0 %v137_v14  ;;  %898 = vmatprep.subr.mxu1 %v170_v15  ;;  %v41_v58 = vld [vmem:[%s1557_s0 + $0x8] sm:$0xff]  ;;  %v159_v61 = vld [vmem:[%s1556_s1 + $0x3a0] sm:$0xff]  ;;  %v110_v62 = vld [vmem:[%s1556_s1 + $0x218] sm:$0xff] }
  0x27   :  { %866 = vmatpush3.msra.mxu0 %v121_v16  ;;  %899 = vmatpush3.msra.mxu1 %v154_v17  ;;  %v144_v59 = vld [vmem:[%s1556_s1 + $0x328] sm:$0xff]  ;;  %v143_v63 = vld [vmem:[%s1556_s1 + $0x320] sm:$0xff]  ;;  %v125_v0 = vld [vmem:[%s1556_s1 + $0x290] sm:$0xff]  ;;  %v220_v1 = vcombine.high %v41_v58, %v41_v58  ;;  %v227_v4 = vrot.slane %v41_v58, %v1150_v48 }
  0x28   :  { %867 = vmatprep.subr.mxu0 %v136_v18  ;;  %900 = vmatprep.subr.mxu1 %v169_v19  ;;  %v158_v2 = vld [vmem:[%s1556_s1 + $0x398] sm:$0xff]  ;;  %v109_v3 = vld [vmem:[%s1556_s1 + $0x210] sm:$0xff]  ;;  %v124_v6 = vld [vmem:[%s1556_s1 + $0x288] sm:$0xff] }
  0x29   :  { %868 = vmatpush3.msra.mxu0 %v120_v20  ;;  %901 = vmatpush3.msra.mxu1 %v153_v21  ;;  %v142_v5 = vld [vmem:[%s1556_s1 + $0x318] sm:$0xff]  ;;  %v157_v7 = vld [vmem:[%s1556_s1 + $0x390] sm:$0xff]  ;;  %v108_v8 = vld [vmem:[%s1556_s1 + $0x208] sm:$0xff]  ;;  %v234_v11 = vrot.slane %v220_v1, %v1150_v48  ;;  %v235_v14 = vcombine.high %v227_v4, %v227_v4  ;;  %v959_v21 = vmov 0.0  }
  0x2a   :  { %869 = vmatprep.subr.mxu0 %v135_v22  ;;  %902 = vmatprep.subr.mxu1 %v168_v23  ;;  %v141_v9 = vld [vmem:[%s1556_s1 + $0x310] sm:$0xff]  ;;  %v123_v10 = vld [vmem:[%s1556_s1 + $0x280] sm:$0xff]  ;;  %v156_v12 = vld [vmem:[%s1556_s1 + $0x388] sm:$0xff] }
  0x2b   :  { %870 = vmatpush3.msra.mxu0 %v119_v24  ;;  %903 = vmatpush3.msra.mxu1 %v152_v25  ;;  %v107_v13 = vld [vmem:[%s1556_s1 + $0x200] sm:$0xff]  ;;  %v140_v15 = vld [vmem:[%s1556_s1 + $0x308] sm:$0xff]  ;;  %v1414_v48 = vld.sshfl [vmem:[%s1557_s0 + $0x10] sm:$0x33 pattern:$0x76325410]  ;;  %v236_v18 = vcombine.high %v234_v11, %v234_v11 }
  0x2c   :  { %871 = vmatprep.subr.mxu0 %v134_v26  ;;  %904 = vmatprep.subr.mxu1 %v167_v27  ;;  %v155_v16 = vld [vmem:[%s1556_s1 + $0x380] sm:$0xff]  ;;  %v186_v19 = vld [vmem:[%s1556_s1 + $0x478] sm:$0xff]  ;;  %v244_v20 = vcombine.high %v1414_v48, %v1414_v48  ;;  %v185_v22 = vld [vmem:[%s1556_s1 + $0x470] sm:$0xff] }
  0x2d   :  { %872 = vmatpush3.msra.mxu0 %v118_v28  ;;  %905 = vmatpush3.msra.mxu1 %v151_v29  ;;  %v139_v17 = vld [vmem:[%s1556_s1 + $0x300] sm:$0xff]  ;;  %v184_v23 = vld [vmem:[%s1556_s1 + $0x468] sm:$0xff]  ;;  %v182_v25 = vld [vmem:[%s1556_s1 + $0x458] sm:$0xff] }
  0x2e   :  { %873 = vmatprep.subr.mxu0 %v133_v30  ;;  %906 = vmatprep.subr.mxu1 %v166_v31  ;;  %v183_v24 = vld [vmem:[%s1556_s1 + $0x460] sm:$0xff]  ;;  %v181_v26 = vld [vmem:[%s1556_s1 + $0x450] sm:$0xff]  ;;  %v180_v27 = vld [vmem:[%s1556_s1 + $0x448] sm:$0xff] }
  0x2f   :  { %874 = vmatpush3.msra.mxu0 %v117_v32  ;;  %907 = vmatpush3.msra.mxu1 %v150_v33  ;;  %v179_v28 = vld [vmem:[%s1556_s1 + $0x440] sm:$0xff]  ;;  %v178_v29 = vld [vmem:[%s1556_s1 + $0x438] sm:$0xff]  ;;  %v177_v30 = vld [vmem:[%s1556_s1 + $0x430] sm:$0xff] }
  0x30   :  { %875 = vmatprep.subr.mxu0 %v132_v34  ;;  %908 = vmatprep.subr.mxu1 %v165_v35  ;;  %v176_v31 = vld [vmem:[%s1556_s1 + $0x428] sm:$0xff]  ;;  %v175_v32 = vld [vmem:[%s1556_s1 + $0x420] sm:$0xff]  ;;  %v174_v33 = vld [vmem:[%s1556_s1 + $0x418] sm:$0xff] }
  0x31   :  { %876 = vmatpush3.msra.mxu0 %v116_v36  ;;  %909 = vmatpush3.msra.mxu1 %v149_v37  ;;  %v173_v34 = vld [vmem:[%s1556_s1 + $0x410] sm:$0xff]  ;;  %v172_v35 = vld [vmem:[%s1556_s1 + $0x408] sm:$0xff]  ;;  %v171_v36 = vld [vmem:[%s1556_s1 + $0x400] sm:$0xff] }
  0x32   :  { %877 = vmatprep.subr.mxu0 %v131_v38  ;;  %910 = vmatprep.subr.mxu1 %v164_v39  ;;  %v190_v37 = vld [vmem:[%s1556_s1 + $0x498] sm:$0xff]  ;;  %v189_v38 = vld [vmem:[%s1556_s1 + $0x490] sm:$0xff]  ;;  %v188_v39 = vld [vmem:[%s1556_s1 + $0x488] sm:$0xff] }
  0x33   :  { %878 = vmatpush3.msra.mxu0 %v115_v40  ;;  %911 = vmatpush3.msra.mxu1 %v148_v41  ;;  %v187_v40 = vld [vmem:[%s1556_s1 + $0x480] sm:$0xff]  ;;  %v641_v1 = vld [vmem:[%s1559_s5 + $0x18] sm:$0xff] }
  0x34   :  { %879 = vmatprep.subr.mxu0 %v130_v42  ;;  %912 = vmatprep.subr.mxu1 %v163_v43 }
  0x35   :  { %880 = vmatpush3.msra.mxu0 %v114_v44  ;;  %913 = vmatpush3.msra.mxu1 %v147_v45 }
  0x36   :  { %881 = vmatprep.subr.mxu0 %v129_v46  ;;  %914 = vmatprep.subr.mxu1 %v162_v47  ;;  %v781_v46 = vld [vmem:[%s1558_s2] ss:$0 sm:$0xff] }
  0x37   :  { %882 = vmatpush3.msra.mxu0 %v113_v49  ;;  %915 = vmatpush3.msra.mxu1 %v146_v50 }
  0x38   :  { %883 = vmatprep.subr.mxu0 %v128_v51  ;;  %916 = vmatprep.subr.mxu1 %v161_v52 }
  0x39   :  { %884 = vmatpush3.msra.mxu0 %v112_v53  ;;  %917 = vmatpush3.msra.mxu1 %v145_v54 }
  0x3a   :  { %885 = vmatprep.subr.mxu0 %v127_v55  ;;  %918 = vmatprep.subr.mxu1 %v160_v56 }
  0x3b   :  { %886 = vmatpush3.msra.mxu0 %v111_v57  ;;  %919 = vmatpush3.msra.mxu1 %v144_v59 }
  0x3c   :  { %887 = vmatprep.subr.mxu0 %v126_v60  ;;  %920 = vmatprep.subr.mxu1 %v159_v61 }
  0x3d   :  { %888 = vmatpush3.msra.mxu0 %v110_v62  ;;  %921 = vmatpush3.msra.mxu1 %v143_v63 }
  0x3e   :  { %889 = vmatprep.subr.mxu0 %v125_v0  ;;  %922 = vmatprep.subr.mxu1 %v158_v2  ;;  %v640_v2 = vld [vmem:[%s1559_s5 + $0x10] sm:$0xff] }
  0x3f   :  { %890 = vmatpush3.msra.mxu0 %v109_v3  ;;  %923 = vmatpush3.msra.mxu1 %v142_v5  ;;  %v639_v3 = vld [vmem:[%s1559_s5 + $0x8] sm:$0xff] }
  0x40   :  { %891 = vmatprep.subr.mxu0 %v124_v6  ;;  %924 = vmatprep.subr.mxu1 %v157_v7 }
  0x41   :  { %892 = vmatpush3.msra.mxu0 %v108_v8  ;;  %925 = vmatpush3.msra.mxu1 %v141_v9 }
  0x42   :  { %893 = vmatprep.subr.mxu0 %v123_v10  ;;  %926 = vmatprep.subr.mxu1 %v156_v12 }
  0x43   :  { %894 = vmatpush3.msra.mxu0 %v107_v13  ;;  %461 = vmatprep.mubr.f32.mxu0 %v235_v14  ;;  %v784_v14 = vld [vmem:[%s1560_s3] ss:$0 sm:$0xff] }
  0x44   :  { %927 = vmatpush3.msra.mxu1 %v140_v15  ;;  %462 = vmatmul.mubr.f32.vlgmr.msra.gmra.mxu0 %v227_v4  ;;  %v638_v4 = vld [vmem:[%s1559_s5] sm:$0xff] }
  0x45   :  { %928 = vmatprep.subr.mxu1 %v155_v16  ;;  %537 = vmatprep.subr.mxu0 %v959_v21 }
  0x46   :  { %929 = vmatpush3.msra.mxu1 %v139_v17  ;;  %531 = vmatprep.mubr.f32.mxu1 %v236_v18 }
  0x47   :  { %538 = vmatpush1.msra.mxu0 %v186_v19  ;;  %532 = vmatmul.mubr.f32.vlgmr.msra.gmra.mxu1 %v234_v11  ;;  %v786_v19 = vld [vmem:[%s1562_s6] ss:$0 sm:$0xff] }
  0x48   :  { %539 = vmatprep.subr.mxu0 %v959_v21  ;;  %783 = vmatprep.mubr.msk.f32.mxu0 %vm254_vm0, %v244_v20 }
  0x49   :  { %540 = vmatpush1.msra.mxu0 %v185_v22  ;;  %938 = vmatprep.subr.mxu1 %v959_v21 }
  0x4a   :  { %541 = vmatprep.subr.mxu0 %v959_v21  ;;  %946 = vmatprep.mubr.msk.f32.mxu1 %vm960_vm2, %v959_v21 }
  0x4b   :  { %542 = vmatpush1.msra.mxu0 %v184_v23  ;;  %939 = vmatpush3.msra.mxu1 %v641_v1 }
  0x4c   :  { %543 = vmatprep.subr.mxu0 %v959_v21  ;;  %940 = vmatprep.subr.mxu1 %v959_v21 }
  0x4d   :  { %544 = vmatpush1.msra.mxu0 %v183_v24  ;;  %941 = vmatpush3.msra.mxu1 %v640_v2 }
  0x4e   :  { %545 = vmatprep.subr.mxu0 %v959_v21  ;;  %942 = vmatprep.subr.mxu1 %v959_v21 }
  0x4f   :  { %546 = vmatpush1.msra.mxu0 %v182_v25  ;;  %943 = vmatpush3.msra.mxu1 %v639_v3 }
  0x50   :  { %547 = vmatprep.subr.mxu0 %v959_v21  ;;  %944 = vmatprep.subr.mxu1 %v959_v21 }
  0x51   :  { %548 = vmatpush1.msra.mxu0 %v181_v26  ;;  %945 = vmatpush3.msra.mxu1 %v638_v4  ;;  %v16_v26 = vstv %s1563_s10 }
  0x52   :  { %549 = vmatprep.subr.mxu0 %v959_v21  ;;  %17 = vst [vmem:[#allocation2] sm:$0x1] %v16_v26 }
  0x53   :  { %550 = vmatpush1.msra.mxu0 %v180_v27 }
  0x54   :  { %551 = vmatprep.subr.mxu0 %v959_v21 }
  0x55   :  { %552 = vmatpush1.msra.mxu0 %v179_v28 }
  0x56   :  { %553 = vmatprep.subr.mxu0 %v959_v21 }
  0x57   :  { %554 = vmatpush1.msra.mxu0 %v178_v29 }
  0x58   :  { %555 = vmatprep.subr.mxu0 %v959_v21 }
  0x59   :  { %556 = vmatpush1.msra.mxu0 %v177_v30 }
  0x5a   :  { %557 = vmatprep.subr.mxu0 %v959_v21 }
  0x5b   :  { %558 = vmatpush1.msra.mxu0 %v176_v31 }
  0x5c   :  { %559 = vmatprep.subr.mxu0 %v959_v21 }
  0x5d   :  { %560 = vmatpush1.msra.mxu0 %v175_v32 }
  0x5e   :  { %561 = vmatprep.subr.mxu0 %v959_v21 }
  0x5f   :  { %562 = vmatpush1.msra.mxu0 %v174_v33 }
  0x60   :  { %563 = vmatprep.subr.mxu0 %v959_v21 }
  0x61   :  { %564 = vmatpush1.msra.mxu0 %v173_v34 }
  0x62   :  { %565 = vmatprep.subr.mxu0 %v959_v21 }
  0x63   :  { %566 = vmatpush1.msra.mxu0 %v172_v35 }
  0x64   :  { %567 = vmatprep.subr.mxu0 %v959_v21 }
  0x65   :  { %568 = vmatpush1.msra.mxu0 %v171_v36  ;;  %v788_v36 = vld [vmem:[%s1564_s7] ss:$0 sm:$0xff] }
  0x66   :  { %593 = vmatprep.subr.mxu0 %v959_v21 }
  0x67   :  { %594 = vmatpush2.msra.mxu0 %v190_v37 }
  0x68   :  { %595 = vmatprep.subr.mxu0 %v959_v21 }
  0x69   :  { %596 = vmatpush2.msra.mxu0 %v189_v38  ;;  %v789_v38 = vld [vmem:[%s1565_s8] ss:$0 sm:$0xff] }
  0x6a   :  { %597 = vmatprep.subr.mxu0 %v959_v21 }
  0x6b   :  { %598 = vmatpush2.msra.mxu0 %v188_v39 }
  0x6c   :  { %599 = vmatprep.subr.mxu0 %v959_v21 }
  0x6d   :  { %600 = vmatpush2.msra.mxu0 %v187_v40 }
  0x6e   :  { %602 = vmatmul.mubr.f32.vlgmr.msra.gmra.mxu0 %v1414_v48  ;;  %v785_v48 = vld [vmem:[%s1561_s4] ss:$0 sm:$0xff] }
  0xe2   :  { %v825_v41 = vpop.f32.mrf.mxu0 }
  0xe4   :  { %v826_v42 = vpop.f32.mrf.mxu0 }
  0xe5   :  { %v860_v43 = vpop.f32.mrf.mxu1  ;;  %v827_v45 = vadd.f32 %v826_v42, %v825_v41  ;;  %v790_v41 = vld [vmem:[%s1566_s9] ss:$0 sm:$0xff] }
  0xe7   :  { %v861_v47 = vpop.f32.mrf.mxu1  ;;  %v324_v51 = vadd.f32 %v827_v45, %v781_v46  ;;  %v791_v45 = vld [vmem:[#allocation2] ss:$0 sm:$0xff] }
  0xe8   :  { %v862_v52 = vadd.f32 %v861_v47, %v860_v43 }
  0xea   :  { %v394_v55 = vadd.f32 %v862_v52, %v324_v51 }
 0x104   :  { %v895_v44 = vpop.f32.mrf.mxu0 }
 0x106   :  { %v896_v49 = vpop.f32.mrf.mxu0 }
 0x107   :  { %v930_v50 = vpop.f32.mrf.mxu1  ;;  %v897_v53 = vadd.f32 %v896_v49, %v895_v44 }
 0x109   :  { %v931_v54 = vpop.f32.mrf.mxu1  ;;  %v464_v56 = vadd.f32 %v897_v53, %v394_v55 }
 0x10a   :  { %v932_v57 = vadd.f32 %v931_v54, %v930_v50 }
 0x10c   :  { %v534_v58 = vadd.f32 %v932_v57, %v464_v56 }
 0x12e   :  { %v603_v59 = vpop.f32.mrf.mxu0 }
 0x12f   :  { %v604_v60 = vadd.f32 %v603_v59, %v534_v58 }
 0x130   :  { %v605_v61 = vpop.f32.mrf.mxu0 }
 0x131   :  { %v608_v62 = vsel %vm607_vm1, %v604_v60, 0.0  ;;  %v612_v63 = vmul.f32 %v604_v60, %v604_v60 }
 0x132   :  { %609 = vadd.xlane.f32.xlu0 %v608_v62 }
 0x133   :  { %v613_v0 = vsel %vm607_vm1, %v612_v63, 0.0 }
 0x136   :  { %614 = vadd.xlane.f32.xlu0 %v613_v0 }
 0x1bb   :  { %v610_v5 = vpop.xlane.xlu0 %609 }
 0x1bc   :  { %v611_v6 = vmul.f32 0.03125, %v610_v5 }
 0x1be   :  { %v618_v8 = vmul.f32 %v611_v6, %v611_v6  ;;  %v617_v12 = vsub.f32 %v604_v60, %v611_v6 }
 0x1bf   :  { %v615_v7 = vpop.xlane.xlu0 %614 }
 0x1c0   :  { %v616_v9 = vmul.f32 0.03125, %v615_v7 }
 0x1c2   :  { %v619_v10 = vsub.f32 %v616_v9, %v618_v8 }
 0x1c4   :  { %v620_v11 = vadd.f32 1e-05, %v619_v10 }
 0x1c6   :  { %954 = vrsqrt.f32 %v620_v11 }
 0x1d3   :  { %v955_v13 = vpop.eup %954 }
 0x1d4   :  { %v622_v15 = vmul.f32 %v955_v13, %v617_v12 }
 0x1d6   :  { %v629_v16 = vmul.f32 %v784_v14, %v622_v15 }
 0x1d8   :  { %v636_v17 = vadd.f32 %v785_v48, %v629_v16 }
 0x1da   :  { %v637_v18 = vmax.f32 %v636_v17, 0.0 }
 0x1dc   :  { %947 = vmatmul.mubr.msk.f32.vlgmr.msra.gmra.mxu1 %vm254_vm0, %v637_v18 }
 0x29c   :  { %v720_v20 = vpop.f32.mrf.mxu1 }
 0x29d   :  { %v721_v21 = vadd.f32 %v786_v19, %v720_v20 }
 0x29e   :  { %v948_v22 = vpop.f32.mrf.mxu1 }
 0x29f   :  { %v724_v23 = vsel %vm607_vm1, %v721_v21, 0.0  ;;  %v728_v24 = vmul.f32 %v721_v21, %v721_v21 }
 0x2a0   :  { %725 = vadd.xlane.f32.xlu1 %v724_v23 }
 0x2a1   :  { %v729_v25 = vsel %vm607_vm1, %v728_v24, 0.0 }
 0x2a4   :  { %730 = vadd.xlane.f32.xlu1 %v729_v25 }
 0x329   :  { %v726_v27 = vpop.xlane.xlu1 %725 }
 0x32a   :  { %v727_v28 = vmul.f32 0.03125, %v726_v27 }
 0x32c   :  { %v734_v30 = vmul.f32 %v727_v28, %v727_v28  ;;  %v733_v34 = vsub.f32 %v721_v21, %v727_v28 }
 0x32d   :  { %v731_v29 = vpop.xlane.xlu1 %730 }
 0x32e   :  { %v732_v31 = vmul.f32 0.03125, %v731_v29 }
 0x330   :  { %v735_v32 = vsub.f32 %v732_v31, %v734_v30 }
 0x332   :  { %v736_v33 = vadd.f32 1e-05, %v735_v32 }
 0x334   :  { %956 = vrsqrt.f32 %v736_v33 }
 0x341   :  { %v957_v35 = vpop.eup %956 }
 0x342   :  { %v738_v37 = vmul.f32 %v957_v35, %v733_v34 }
 0x344   :  { %v745_v39 = vmul.f32 %v788_v36, %v738_v37 }
 0x346   :  { %v752_v40 = vadd.f32 %v789_v38, %v745_v39 }
 0x348   :  { %v753_v42 = vmax.f32 %v752_v40, 0.0 }
 0x34a   :  { %v762_v43 = vmul.f32 %v790_v41, %v753_v42 }
 0x34c   :  { %v763_v44 = vsel %vm607_vm1, %v762_v43, 0.0 }
 0x34d   :  { %764 = vadd.xlane.f32.xlu0 %v763_v44 }
 0x3d6   :  { %v765_v46 = vpop.xlane.xlu0 %764 }
 0x3d7   :  { %v772_v47 = vadd.f32 %v791_v45, %v765_v46 }
 0x3d9   :  { %v792_v49 = vclamps-f32 %v772_v47, 10.0 }
 0x3db   :  { %776 = vst.msk [vmem:[%s1567_s11] sm:$0x3] %vm775_vm3, %v792_v49 }

// kernel: _lambda_.2
= control target key start
LH: loop header
LB: loop body
LE: loop exit
PB: predicated region body
PF: predicated region fallthrough
CT: control target
= control target key end

     0   :  { %s3422_s18 = smov 0   ;;  %s4198_s0 = inlined_call_operand.vmem [shape: f32[8,64,4], index: 0, kind: input, shape index: {}]   ;;  %s4199_s1 = inlined_call_operand.vmem [shape: f32[9,4,32], index: 1, kind: input, shape index: {}]   ;;  %s4200_s2 = inlined_call_operand.vmem [shape: f32[1,32], index: 2, kind: input, shape index: {}]   ;;  %s4201_s3 = inlined_call_operand.vmem [shape: f32[9,32,32], index: 3, kind: input, shape index: {}]   ;;  %s4202_s4 = inlined_call_operand.vmem [shape: f32[1,32], index: 4, kind: input, shape index: {}]   ;;  %s4203_s5 = inlined_call_operand.vmem [shape: f32[2,37,32], index: 5, kind: output, shape index: {}]  }
   0x1 LB: > { %s3428_s19 = sadd.s32 4294967295, %s3388_s18   ;;  %p2640_p0 = scmp.ge.s32.totalorder %s3388_s18, 1  ;;  %s3388_s18 = sphi %s3422_s18, %s15_s18  }
   0x2   : > { %p189_p1 = scmp.lt.s32.totalorder %s3388_s18, 3 }
   0x4   : > { %p190_p2 = pnand %p2640_p0, %p189_p1 }
   0x5   : > { %s2641_s22 = sshll.u32 (!%p190_p2), %s3428_s19, 2  ;;  %p225_p4 = scmp.lt.s32.totalorder (!%p190_p2), %s3428_s19, 1 }
   0x6   : > { %193 = sbr.rel (%p190_p2) target bundleno = 632 (0x278), region = 40  ;;  %p219_p3 = scmp.lt.s32.totalorder (!%p190_p2), %s2641_s22, 7 }
   0xb   : > { %v231_v0 = vld [vmem:[%s4199_s1 + $0x4] sm:$0xf]  ;;  %vm276_vm0 = vcmask 1043456   ;;  %v3390_v1 = vmov 0.0   ;;  %vm3391_vm1 = vmmov 0   ;;  %s4205_s22 = smov (!%p219_p3, %s2641_s22), 7 }
   0xc   : > { %2955 = vmatprep.subr.mxu0 %v3390_v1  ;;  %3369 = vmatprep.subr.mxu1 %v3390_v1  ;;  %s2801_s23 = sshll.u32 %s4205_s22, 6  ;;  %vm254_vm2 = vcmask 31744   ;;  %v232_v2 = vld [vmem:[%s4199_s1 + $0x8] sm:$0xf]  ;;  %v230_v5 = vld [vmem:[%s4199_s1] sm:$0xf] }
   0xd   : > { %2956 = vmatpush3.msk.msra.mxu0 %vm276_vm0, %v231_v0  ;;  %3370 = vmatpush3.msk.msra.mxu1 %vm276_vm0, %v231_v0  ;;  %s3449_s26 = scalar_lea.vmem %s4198_s0, %s2801_s23  ;;  %v233_v8 = vld [vmem:[%s4199_s1 + $0xc] sm:$0xf]  ;;  %v234_v19 = vld [vmem:[%s4199_s1 + $0x10] sm:$0xf]  ;;  %v235_v24 = vld [vmem:[%s4199_s1 + $0x14] sm:$0xf] }
   0xe   : > { %2957 = vmatprep.mubr.msk.f32.mxu0 %vm3391_vm1, %v3390_v1  ;;  %2975 = vmatprep.mubr.msk.f32.mxu1 %vm3391_vm1, %v3390_v1  ;;  %v2645_v3 = vld [vmem:[%s3449_s26 + $0x40] sm:$0xff]  ;;  %v2651_v4 = vld [vmem:[%s3449_s26 + $0x70] sm:$0x7f]  ;;  %v3465_v6 = vld [vmem:[%s3449_s26 + $0x48] sm:$0xff]  ;;  %vm1493_vm3 = vcmask 261120   ;;  %vm1500_vm4 = vcmask 260096  }
   0xf   : > { %3001 = vmatprep.subr.mxu0 %v3390_v1  ;;  %2978 = vmatprep.subr.mxu1 %v3390_v1  ;;  %v239_v7 = vld [vmem:[%s3449_s26] sm:$0xff]  ;;  %v3484_v9 = vld [vmem:[%s3449_s26 + $0x50] sm:$0xff]  ;;  %v3487_v10 = vld [vmem:[%s3449_s26 + $0x8] sm:$0xff]  ;;  %s4207_s19 = smov (!%p225_p4, %s3428_s19), 1  ;;  %vm2579_vm5 = vcmask 258048  }
  0x10   : > { %2958 = vmatmul.mubr.msk.f32.vlgmr.msra.gmra.mxu0 %vm254_vm2, %v2645_v3  ;;  %2976 = vmatmul.mubr.msk.f32.vlgmr.msra.gmra.mxu1 %vm254_vm2, %v2651_v4  ;;  %v3500_v11 = vld [vmem:[%s3449_s26 + $0x58] sm:$0xff]  ;;  %v3503_v12 = vld [vmem:[%s3449_s26 + $0x10] sm:$0xff]  ;;  %v3514_v13 = vld [vmem:[%s3449_s26 + $0x60] sm:$0xff]  ;;  %s3371_s25 = smul.u32 40, %s4207_s19 }
  0x11   : > { %3002 = vmatpush3.msk.msra.mxu0 %vm276_vm0, %v232_v2  ;;  %2960 = vmatprep.mubr.msk.f32.mxu0 %vm3391_vm1, %v3390_v1  ;;  %v3517_v14 = vld [vmem:[%s3449_s26 + $0x18] sm:$0xff]  ;;  %v3528_v15 = vld [vmem:[%s3449_s26 + $0x68] sm:$0xff]  ;;  %v3531_v16 = vld [vmem:[%s3449_s26 + $0x20] sm:$0xff] }
  0x12   : > { %2979 = vmatpush3.msk.msra.mxu1 %vm276_vm0, %v230_v5  ;;  %2980 = vmatprep.mubr.msk.f32.mxu1 %vm3391_vm1, %v3390_v1  ;;  %v3542_v17 = vld [vmem:[%s3449_s26 + $0x28] sm:$0xff]  ;;  %v245_v20 = vld [vmem:[%s3449_s26 + $0x30] sm:$0x7f]  ;;  %v2676_v23 = vld [vmem:[%s3449_s26 + $0x80] sm:$0xff]  ;;  %s4179_s30 = scalar_lea.vmem %s4203_s5, %s3371_s25 }
  0x13   : > { %3024 = vmatprep.subr.mxu1 %v3390_v1  ;;  %3047 = vmatprep.subr.mxu0 %v3390_v1  ;;  %v504_v18 = vld [vmem:[%s3449_s26 + $0x1] sm:$0xff]  ;;  %v3556_v21 = vld [vmem:[%s3449_s26 + $0x9] sm:$0xff]  ;;  %v3569_v22 = vld [vmem:[%s3449_s26 + $0x11] sm:$0xff] }
  0x14   : > { %2961 = vmatmul.mubr.msk.f32.gmra.mxu0 %vm254_vm2, %v3465_v6  ;;  %2981 = vmatmul.mubr.msk.f32.vlgmr.msra.gmra.mxu1 %vm254_vm2, %v239_v7  ;;  %v3583_v25 = vld [vmem:[%s3449_s26 + $0x19] sm:$0xff]  ;;  %v2677_v26 = vld [vmem:[%s3449_s26 + $0x88] sm:$0xff]  ;;  %v2678_v28 = vld [vmem:[%s3449_s26 + $0x90] sm:$0xff] }
  0x15   : > { %2963 = vmatprep.mubr.msk.f32.mxu0 %vm3391_vm1, %v3390_v1  ;;  %2983 = vmatprep.mubr.msk.f32.mxu1 %vm3391_vm1, %v3390_v1  ;;  %v3596_v27 = vld [vmem:[%s3449_s26 + $0x21] sm:$0xff]  ;;  %v3607_v29 = vld [vmem:[%s3449_s26 + $0x29] sm:$0xff]  ;;  %v2679_v30 = vld [vmem:[%s3449_s26 + $0x98] sm:$0xff] }
  0x16   : > { %3025 = vmatpush3.msk.msra.mxu1 %vm276_vm0, %v233_v8  ;;  %v510_v31 = vld [vmem:[%s3449_s26 + $0x31] sm:$0x7f]  ;;  %v2680_v32 = vld [vmem:[%s3449_s26 + $0xa0] sm:$0xff]  ;;  %v2681_v33 = vld [vmem:[%s3449_s26 + $0xa8] sm:$0xff] }
  0x17   : > { %3070 = vmatprep.subr.mxu1 %v3390_v1  ;;  %v2691_v34 = vld [vmem:[%s3449_s26 + $0xc0] sm:$0xff]  ;;  %v236_v35 = vld [vmem:[%s4199_s1 + $0x18] sm:$0xf]  ;;  %v2682_v36 = vld [vmem:[%s3449_s26 + $0xb0] sm:$0x7f] }
  0x18   : > { %2964 = vmatmul.mubr.msk.f32.gmra.mxu0 %vm254_vm2, %v3484_v9  ;;  %2984 = vmatmul.mubr.msk.f32.gmra.mxu1 %vm254_vm2, %v3487_v10  ;;  %v2692_v37 = vld [vmem:[%s3449_s26 + $0xc8] sm:$0xff]  ;;  %v2693_v38 = vld [vmem:[%s3449_s26 + $0xd0] sm:$0xff]  ;;  %v237_v40 = vld [vmem:[%s4199_s1 + $0x1c] sm:$0xf] }
  0x19   : > { %2966 = vmatprep.mubr.msk.f32.mxu0 %vm3391_vm1, %v3390_v1  ;;  %2986 = vmatprep.mubr.msk.f32.mxu1 %vm3391_vm1, %v3390_v1  ;;  %v2706_v39 = vld [vmem:[%s3449_s26 + $0x81] sm:$0xff]  ;;  %v2694_v41 = vld [vmem:[%s3449_s26 + $0xd8] sm:$0xff]  ;;  %v2707_v42 = vld [vmem:[%s3449_s26 + $0x89] sm:$0xff] }
  0x1a   : > { %v2695_v43 = vld [vmem:[%s3449_s26 + $0xe0] sm:$0xff]  ;;  %v2708_v44 = vld [vmem:[%s3449_s26 + $0x91] sm:$0xff]  ;;  %v2696_v45 = vld [vmem:[%s3449_s26 + $0xe8] sm:$0xff] }
  0x1b   : > { %v2709_v46 = vld [vmem:[%s3449_s26 + $0x99] sm:$0xff]  ;;  %v2697_v47 = vld [vmem:[%s3449_s26 + $0xf0] sm:$0x7f]  ;;  %v2710_v48 = vld [vmem:[%s3449_s26 + $0xa1] sm:$0xff] }
  0x1c   : > { %2967 = vmatmul.mubr.msk.f32.gmra.mxu0 %vm254_vm2, %v3500_v11  ;;  %2987 = vmatmul.mubr.msk.f32.gmra.mxu1 %vm254_vm2, %v3503_v12  ;;  %v2711_v49 = vld [vmem:[%s3449_s26 + $0xa9] sm:$0xff]  ;;  %v238_v50 = vld [vmem:[%s4199_s1 + $0x20] sm:$0xf]  ;;  %v2712_v51 = vld [vmem:[%s3449_s26 + $0xb1] sm:$0x7f] }
  0x1d   : > { %2969 = vmatprep.mubr.msk.f32.mxu0 %vm3391_vm1, %v3390_v1  ;;  %2989 = vmatprep.mubr.msk.f32.mxu1 %vm3391_vm1, %v3390_v1  ;;  %v1063_v52 = vld [vmem:[%s3449_s26 + $0x30] sm:$0xff]  ;;  %v1064_v53 = vld [vmem:[%s3449_s26 + $0x38] sm:$0x7f]  ;;  %v1507_v60 = vld [vmem:[%s4201_s3 + $0x28] sm:$0xff] }
  0x1e   : > { %v2734_v54 = vld [vmem:[%s3449_s26 + $0x70] sm:$0xff]  ;;  %v2735_v55 = vld [vmem:[%s3449_s26 + $0x78] sm:$0x7f]  ;;  %v1511_v63 = vld [vmem:[%s4201_s3 + $0x48] sm:$0xff] }
  0x1f   : > { %v1339_v56 = vld [vmem:[%s3449_s26 + $0x31] sm:$0xff]  ;;  %v1340_v57 = vld [vmem:[%s3449_s26 + $0x39] sm:$0x7f]  ;;  %v1506_v0 = vld [vmem:[%s4201_s3 + $0x20] sm:$0xff] }
  0x20   : > { %2970 = vmatmul.mubr.msk.f32.gmra.mxu0 %vm254_vm2, %v3514_v13  ;;  %2990 = vmatmul.mubr.msk.f32.gmra.mxu1 %vm254_vm2, %v3517_v14  ;;  %v1509_v58 = vld [vmem:[%s4201_s3 + $0x38] sm:$0xff]  ;;  %v1508_v59 = vld [vmem:[%s4201_s3 + $0x30] sm:$0xff]  ;;  %v1510_v2 = vld [vmem:[%s4201_s3 + $0x40] sm:$0xff] }
  0x21   : > { %2972 = vmatprep.mubr.msk.f32.mxu0 %vm3391_vm1, %v3390_v1  ;;  %2992 = vmatprep.mubr.msk.f32.mxu1 %vm3391_vm1, %v3390_v1  ;;  %v1513_v61 = vld [vmem:[%s4201_s3 + $0x58] sm:$0xff]  ;;  %v1512_v62 = vld [vmem:[%s4201_s3 + $0x50] sm:$0xff] }
  0x24   : > { %2973 = vmatmul.mubr.msk.f32.gmra.mxu0 %vm254_vm2, %v3528_v15  ;;  %2993 = vmatmul.mubr.msk.f32.gmra.mxu1 %vm254_vm2, %v3531_v16 }
  0x25   : > { %2995 = vmatprep.mubr.msk.f32.mxu1 %vm3391_vm1, %v3390_v1  ;;  %3003 = vmatprep.mubr.msk.f32.mxu0 %vm3391_vm1, %v3390_v1 }
  0x28   : > { %2996 = vmatmul.mubr.msk.f32.gmra.mxu1 %vm254_vm2, %v3542_v17  ;;  %3004 = vmatmul.mubr.msk.f32.vlgmr.msra.gmra.mxu0 %vm254_vm2, %v504_v18 }
  0x29   : > { %3048 = vmatpush3.msk.msra.mxu0 %vm276_vm0, %v234_v19  ;;  %2998 = vmatprep.mubr.msk.f32.mxu1 %vm3391_vm1, %v3390_v1 }
  0x2a   : > { %3006 = vmatprep.mubr.msk.f32.mxu0 %vm3391_vm1, %v3390_v1  ;;  %3093 = vmatprep.subr.mxu0 %v3390_v1 }
  0x2c   : > { %2999 = vmatmul.mubr.msk.f32.gmra.mxu1 %vm254_vm2, %v245_v20  ;;  %3007 = vmatmul.mubr.msk.f32.gmra.mxu0 %vm254_vm2, %v3556_v21 }
  0x2d   : > { %3009 = vmatprep.mubr.msk.f32.mxu0 %vm3391_vm1, %v3390_v1  ;;  %3026 = vmatprep.mubr.msk.f32.mxu1 %vm3391_vm1, %v3390_v1 }
  0x30   : > { %3010 = vmatmul.mubr.msk.f32.gmra.mxu0 %vm254_vm2, %v3569_v22  ;;  %3027 = vmatmul.mubr.msk.f32.vlgmr.msra.gmra.mxu1 %vm254_vm2, %v2676_v23 }
  0x31   : > { %3012 = vmatprep.mubr.msk.f32.mxu0 %vm3391_vm1, %v3390_v1  ;;  %3029 = vmatprep.mubr.msk.f32.mxu1 %vm3391_vm1, %v3390_v1 }
  0x32   : > { %3071 = vmatpush3.msk.msra.mxu1 %vm276_vm0, %v235_v24 }
  0x33   : > { %3116 = vmatprep.subr.mxu1 %v3390_v1 }
  0x34   : > { %3013 = vmatmul.mubr.msk.f32.gmra.mxu0 %vm254_vm2, %v3583_v25  ;;  %3030 = vmatmul.mubr.msk.f32.gmra.mxu1 %vm254_vm2, %v2677_v26 }
  0x35   : > { %3015 = vmatprep.mubr.msk.f32.mxu0 %vm3391_vm1, %v3390_v1  ;;  %3032 = vmatprep.mubr.msk.f32.mxu1 %vm3391_vm1, %v3390_v1 }
  0x38   : > { %3016 = vmatmul.mubr.msk.f32.gmra.mxu0 %vm254_vm2, %v3596_v27  ;;  %3033 = vmatmul.mubr.msk.f32.gmra.mxu1 %vm254_vm2, %v2678_v28 }
  0x39   : > { %3018 = vmatprep.mubr.msk.f32.mxu0 %vm3391_vm1, %v3390_v1  ;;  %3035 = vmatprep.mubr.msk.f32.mxu1 %vm3391_vm1, %v3390_v1 }
  0x3c   : > { %3019 = vmatmul.mubr.msk.f32.gmra.mxu0 %vm254_vm2, %v3607_v29  ;;  %3036 = vmatmul.mubr.msk.f32.gmra.mxu1 %vm254_vm2, %v2679_v30 }
  0x3d   : > { %3021 = vmatprep.mubr.msk.f32.mxu0 %vm3391_vm1, %v3390_v1  ;;  %3038 = vmatprep.mubr.msk.f32.mxu1 %vm3391_vm1, %v3390_v1 }
  0x40   : > { %3022 = vmatmul.mubr.msk.f32.gmra.mxu0 %vm254_vm2, %v510_v31  ;;  %3039 = vmatmul.mubr.msk.f32.gmra.mxu1 %vm254_vm2, %v2680_v32 }
  0x41   : > { %3041 = vmatprep.mubr.msk.f32.mxu1 %vm3391_vm1, %v3390_v1  ;;  %3049 = vmatprep.mubr.msk.f32.mxu0 %vm3391_vm1, %v3390_v1 }
  0x44   : > { %3042 = vmatmul.mubr.msk.f32.gmra.mxu1 %vm254_vm2, %v2681_v33  ;;  %3050 = vmatmul.mubr.msk.f32.vlgmr.msra.gmra.mxu0 %vm254_vm2, %v2691_v34 }
  0x45   : > { %3094 = vmatpush3.msk.msra.mxu0 %vm276_vm0, %v236_v35  ;;  %3044 = vmatprep.mubr.msk.f32.mxu1 %vm3391_vm1, %v3390_v1 }
  0x46   : > { %3052 = vmatprep.mubr.msk.f32.mxu0 %vm3391_vm1, %v3390_v1  ;;  %3139 = vmatprep.subr.mxu0 %v3390_v1 }
  0x48   : > { %3045 = vmatmul.mubr.msk.f32.gmra.mxu1 %vm254_vm2, %v2682_v36  ;;  %3053 = vmatmul.mubr.msk.f32.gmra.mxu0 %vm254_vm2, %v2692_v37 }
  0x49   : > { %3055 = vmatprep.mubr.msk.f32.mxu0 %vm3391_vm1, %v3390_v1  ;;  %3072 = vmatprep.mubr.msk.f32.mxu1 %vm3391_vm1, %v3390_v1 }
  0x4c   : > { %3056 = vmatmul.mubr.msk.f32.gmra.mxu0 %vm254_vm2, %v2693_v38  ;;  %3073 = vmatmul.mubr.msk.f32.vlgmr.msra.gmra.mxu1 %vm254_vm2, %v2706_v39 }
  0x4d   : > { %3058 = vmatprep.mubr.msk.f32.mxu0 %vm3391_vm1, %v3390_v1  ;;  %3075 = vmatprep.mubr.msk.f32.mxu1 %vm3391_vm1, %v3390_v1 }
  0x4e   : > { %3117 = vmatpush3.msk.msra.mxu1 %vm276_vm0, %v237_v40 }
  0x4f   : > { %3162 = vmatprep.subr.mxu1 %v3390_v1 }
  0x50   : > { %3059 = vmatmul.mubr.msk.f32.gmra.mxu0 %vm254_vm2, %v2694_v41  ;;  %3076 = vmatmul.mubr.msk.f32.gmra.mxu1 %vm254_vm2, %v2707_v42 }
  0x51   : > { %3061 = vmatprep.mubr.msk.f32.mxu0 %vm3391_vm1, %v3390_v1  ;;  %3078 = vmatprep.mubr.msk.f32.mxu1 %vm3391_vm1, %v3390_v1 }
  0x54   : > { %3062 = vmatmul.mubr.msk.f32.gmra.mxu0 %vm254_vm2, %v2695_v43  ;;  %3079 = vmatmul.mubr.msk.f32.gmra.mxu1 %vm254_vm2, %v2708_v44 }
  0x55   : > { %3064 = vmatprep.mubr.msk.f32.mxu0 %vm3391_vm1, %v3390_v1  ;;  %3081 = vmatprep.mubr.msk.f32.mxu1 %vm3391_vm1, %v3390_v1 }
  0x58   : > { %3065 = vmatmul.mubr.msk.f32.gmra.mxu0 %vm254_vm2, %v2696_v45  ;;  %3082 = vmatmul.mubr.msk.f32.gmra.mxu1 %vm254_vm2, %v2709_v46 }
  0x59   : > { %3067 = vmatprep.mubr.msk.f32.mxu0 %vm3391_vm1, %v3390_v1  ;;  %3084 = vmatprep.mubr.msk.f32.mxu1 %vm3391_vm1, %v3390_v1 }
  0x5c   : > { %3068 = vmatmul.mubr.msk.f32.gmra.mxu0 %vm254_vm2, %v2697_v47  ;;  %3085 = vmatmul.mubr.msk.f32.gmra.mxu1 %vm254_vm2, %v2710_v48 }
  0x5d   : > { %3087 = vmatprep.mubr.msk.f32.mxu1 %vm3391_vm1, %v3390_v1  ;;  %3095 = vmatprep.mubr.msk.f32.mxu0 %vm3391_vm1, %v3390_v1 }
  0x60   : > { %3088 = vmatmul.mubr.msk.f32.gmra.mxu1 %vm254_vm2, %v2711_v49  ;;  %3096 = vmatmul.mubr.msk.f32.vlgmr.msra.gmra.mxu0 %vm254_vm2, %v3487_v10 }
  0x61   : > { %3140 = vmatpush3.msk.msra.mxu0 %vm276_vm0, %v238_v50  ;;  %3090 = vmatprep.mubr.msk.f32.mxu1 %vm3391_vm1, %v3390_v1 }
  0x62   : > { %3098 = vmatprep.mubr.msk.f32.mxu0 %vm3391_vm1, %v3390_v1  ;;  %3208 = vmatprep.subr.mxu0 %v3390_v1 }
  0x64   : > { %3091 = vmatmul.mubr.msk.f32.gmra.mxu1 %vm254_vm2, %v2712_v51  ;;  %3099 = vmatmul.mubr.msk.f32.gmra.mxu0 %vm254_vm2, %v3503_v12 }
  0x65   : > { %3101 = vmatprep.mubr.msk.f32.mxu0 %vm3391_vm1, %v3390_v1  ;;  %3118 = vmatprep.mubr.msk.f32.mxu1 %vm3391_vm1, %v3390_v1 }
  0x68   : > { %3102 = vmatmul.mubr.msk.f32.gmra.mxu0 %vm254_vm2, %v3517_v14  ;;  %3119 = vmatmul.mubr.msk.f32.vlgmr.msra.gmra.mxu1 %vm254_vm2, %v3465_v6 }
  0x69   : > { %3104 = vmatprep.mubr.msk.f32.mxu0 %vm3391_vm1, %v3390_v1  ;;  %3121 = vmatprep.mubr.msk.f32.mxu1 %vm3391_vm1, %v3390_v1 }
  0x6a   : > { %3163 = vmatpush3.msra.mxu1 %v1509_v58 }
  0x6b   : > { %3164 = vmatprep.subr.mxu1 %v3390_v1 }
  0x6c   : > { %3105 = vmatmul.mubr.msk.f32.gmra.mxu0 %vm254_vm2, %v3531_v16  ;;  %3122 = vmatmul.mubr.msk.f32.gmra.mxu1 %vm254_vm2, %v3484_v9 }
  0x6d   : > { %3107 = vmatprep.mubr.msk.f32.mxu0 %vm3391_vm1, %v3390_v1  ;;  %3124 = vmatprep.mubr.msk.f32.mxu1 %vm3391_vm1, %v3390_v1 }
  0x6e   : > { %3165 = vmatpush3.msra.mxu1 %v1508_v59 }
  0x6f   : > { %3166 = vmatprep.subr.mxu1 %v3390_v1 }
  0x70   : > { %3108 = vmatmul.mubr.msk.f32.gmra.mxu0 %vm254_vm2, %v3542_v17  ;;  %3125 = vmatmul.mubr.msk.f32.gmra.mxu1 %vm254_vm2, %v3500_v11 }
  0x71   : > { %3110 = vmatprep.mubr.msk.f32.mxu0 %vm3391_vm1, %v3390_v1  ;;  %3127 = vmatprep.mubr.msk.f32.mxu1 %vm3391_vm1, %v3390_v1 }
  0x72   : > { %3167 = vmatpush3.msra.mxu1 %v1507_v60 }
  0x73   : > { %3168 = vmatprep.subr.mxu1 %v3390_v1 }
  0x74   : > { %3111 = vmatmul.mubr.msk.f32.gmra.mxu0 %vm254_vm2, %v1063_v52  ;;  %3128 = vmatmul.mubr.msk.f32.gmra.mxu1 %vm254_vm2, %v3514_v13 }
  0x75   : > { %3113 = vmatprep.mubr.msk.f32.mxu0 %vm3391_vm1, %v3390_v1  ;;  %3130 = vmatprep.mubr.msk.f32.mxu1 %vm3391_vm1, %v3390_v1 }
  0x76   : > { %3169 = vmatpush3.msra.mxu1 %v1506_v0 }
  0x77   : > { %3185 = vmatprep.subr.mxu1 %v3390_v1 }
  0x78   : > { %3114 = vmatmul.mubr.msk.f32.gmra.mxu0 %vm254_vm2, %v1064_v53  ;;  %3131 = vmatmul.mubr.msk.f32.gmra.mxu1 %vm254_vm2, %v3528_v15 }
  0x79   : > { %3133 = vmatprep.mubr.msk.f32.mxu1 %vm3391_vm1, %v3390_v1  ;;  %3141 = vmatprep.mubr.msk.f32.mxu0 %vm3391_vm1, %v3390_v1 }
  0x7c   : > { %3134 = vmatmul.mubr.msk.f32.gmra.mxu1 %vm254_vm2, %v2734_v54  ;;  %3142 = vmatmul.mubr.msk.f32.vlgmr.msra.gmra.mxu0 %vm254_vm2, %v3556_v21 }
  0x7d   : > { %3136 = vmatprep.mubr.msk.f32.mxu1 %vm3391_vm1, %v3390_v1  ;;  %3144 = vmatprep.mubr.msk.f32.mxu0 %vm3391_vm1, %v3390_v1 }
  0x7e   : > { %3209 = vmatpush3.msra.mxu0 %v1513_v61 }
  0x7f   : > { %3210 = vmatprep.subr.mxu0 %v3390_v1 }
  0x80   : > { %3137 = vmatmul.mubr.msk.f32.gmra.mxu1 %vm254_vm2, %v2735_v55  ;;  %3145 = vmatmul.mubr.msk.f32.gmra.mxu0 %vm254_vm2, %v3569_v22 }
  0x81   : > { %3147 = vmatprep.mubr.msk.f32.mxu0 %vm3391_vm1, %v3390_v1  ;;  %3170 = vmatprep.mubr.msk.f32.mxu1 %vm3391_vm1, %v3390_v1 }
  0x82   : > { %3211 = vmatpush3.msra.mxu0 %v1512_v62 }
  0x83   : > { %3212 = vmatprep.subr.mxu0 %v3390_v1 }
  0x84   : > { %3148 = vmatmul.mubr.msk.f32.gmra.mxu0 %vm254_vm2, %v3583_v25 }
  0x85   : > { %3150 = vmatprep.mubr.msk.f32.mxu0 %vm3391_vm1, %v3390_v1  ;;  %3213 = vmatpush3.msra.mxu0 %v1511_v63 }
  0x86   : > { %3214 = vmatprep.subr.mxu0 %v3390_v1 }
  0x87   : > { %3215 = vmatpush3.msra.mxu0 %v1510_v2 }
  0x88   : > { %3151 = vmatmul.mubr.msk.f32.gmra.mxu0 %vm254_vm2, %v3596_v27  ;;  %3254 = vmatprep.subr.mxu0 %v3390_v1 }
  0x89   : > { %3153 = vmatprep.mubr.msk.f32.mxu0 %vm3391_vm1, %v3390_v1 }
  0x8c   : > { %3154 = vmatmul.mubr.msk.f32.gmra.mxu0 %vm254_vm2, %v3607_v29 }
  0x8d   : > { %3156 = vmatprep.mubr.msk.f32.mxu0 %vm3391_vm1, %v3390_v1 }
  0x90   : > { %3157 = vmatmul.mubr.msk.f32.gmra.mxu0 %vm254_vm2, %v1339_v56 }
  0x91   : > { %3159 = vmatprep.mubr.msk.f32.mxu0 %vm3391_vm1, %v3390_v1 }
  0x94   : > { %3160 = vmatmul.mubr.msk.f32.gmra.mxu0 %vm254_vm2, %v1340_v57 }
  0x95   : > { %3216 = vmatprep.mubr.msk.f32.mxu0 %vm3391_vm1, %v3390_v1 }
  0xd0   : > { %v346_v3 = vpop.f32.mrf.mxu0  ;;  %v376_v4 = vpop.f32.mrf.mxu1 }
  0xd2   : > { %v2959_v5 = vpop.f32.mrf.mxu0  ;;  %v2977_v6 = vpop.f32.mrf.mxu1 }
  0xd4   : > { %v351_v7 = vpop.f32.mrf.mxu0  ;;  %v470_v8 = vpop.f32.mrf.mxu1 }
  0xd5   : > { %v471_v9 = vadd.f32 %v470_v8, %v346_v3 }
  0xd6   : > { %v2962_v10 = vpop.f32.mrf.mxu0  ;;  %v2982_v11 = vpop.f32.mrf.mxu1 }
  0xd8   : > { %v356_v12 = vpop.f32.mrf.mxu0  ;;  %v475_v13 = vpop.f32.mrf.mxu1 }
  0xd9   : > { %v476_v14 = vadd.f32 %v475_v13, %v351_v7 }
  0xda   : > { %v2965_v15 = vpop.f32.mrf.mxu0  ;;  %v2985_v16 = vpop.f32.mrf.mxu1 }
  0xdc   : > { %v361_v17 = vpop.f32.mrf.mxu0  ;;  %v480_v18 = vpop.f32.mrf.mxu1 }
  0xdd   : > { %v481_v19 = vadd.f32 %v480_v18, %v356_v12 }
  0xde   : > { %v2968_v20 = vpop.f32.mrf.mxu0  ;;  %v2988_v21 = vpop.f32.mrf.mxu1 }
  0xe0   : > { %v366_v22 = vpop.f32.mrf.mxu0  ;;  %v485_v23 = vpop.f32.mrf.mxu1 }
  0xe1   : > { %v486_v24 = vadd.f32 %v485_v23, %v361_v17 }
  0xe2   : > { %v2971_v25 = vpop.f32.mrf.mxu0  ;;  %v2991_v26 = vpop.f32.mrf.mxu1 }
  0xe4   : > { %v371_v27 = vpop.f32.mrf.mxu0  ;;  %v490_v28 = vpop.f32.mrf.mxu1 }
  0xe5   : > { %v491_v29 = vadd.f32 %v490_v28, %v366_v22 }
  0xe6   : > { %v2974_v30 = vpop.f32.mrf.mxu0  ;;  %v2994_v31 = vpop.f32.mrf.mxu1 }
  0xe8   : > { %v495_v32 = vpop.f32.mrf.mxu1  ;;  %v601_v33 = vpop.f32.mrf.mxu0 }
  0xe9   : > { %v496_v34 = vadd.f32 %v495_v32, %v371_v27  ;;  %v635_v35 = vadd.f32 %v601_v33, %v471_v9 }
  0xea   : > { %v2997_v36 = vpop.f32.mrf.mxu1  ;;  %v3005_v37 = vpop.f32.mrf.mxu0 }
  0xec   : > { %v500_v38 = vpop.f32.mrf.mxu1  ;;  %v606_v39 = vpop.f32.mrf.mxu0 }
  0xed   : > { %v501_v40 = vadd.f32 %v500_v38, %v376_v4  ;;  %v636_v41 = vadd.f32 %v606_v39, %v476_v14 }
  0xee   : > { %v3000_v42 = vpop.f32.mrf.mxu1  ;;  %v3008_v43 = vpop.f32.mrf.mxu0 }
  0xf0   : > { %v611_v44 = vpop.f32.mrf.mxu0  ;;  %v740_v45 = vpop.f32.mrf.mxu1 }
  0xf1   : > { %v637_v46 = vadd.f32 %v611_v44, %v481_v19  ;;  %v3820_v47 = vadd.f32 %v740_v45, %v635_v35 }
  0xf2   : > { %v3011_v48 = vpop.f32.mrf.mxu0  ;;  %v3028_v49 = vpop.f32.mrf.mxu1 }
  0xf4   : > { %v616_v50 = vpop.f32.mrf.mxu0  ;;  %v745_v51 = vpop.f32.mrf.mxu1 }
  0xf5   : > { %v638_v52 = vadd.f32 %v616_v50, %v486_v24  ;;  %v3822_v53 = vadd.f32 %v745_v51, %v636_v41 }
  0xf6   : > { %v3014_v54 = vpop.f32.mrf.mxu0  ;;  %v3031_v55 = vpop.f32.mrf.mxu1 }
  0xf8   : > { %v621_v56 = vpop.f32.mrf.mxu0  ;;  %v750_v57 = vpop.f32.mrf.mxu1 }
  0xf9   : > { %v639_v58 = vadd.f32 %v621_v56, %v491_v29  ;;  %v3824_v59 = vadd.f32 %v750_v57, %v637_v46 }
  0xfa   : > { %v3017_v60 = vpop.f32.mrf.mxu0  ;;  %v3034_v61 = vpop.f32.mrf.mxu1 }
  0xfc   : > { %v626_v62 = vpop.f32.mrf.mxu0  ;;  %v755_v63 = vpop.f32.mrf.mxu1 }
  0xfd   : > { %v640_v0 = vadd.f32 %v626_v62, %v496_v34  ;;  %v3826_v2 = vadd.f32 %v755_v63, %v638_v52 }
  0xfe   : > { %v3020_v3 = vpop.f32.mrf.mxu0  ;;  %v3037_v4 = vpop.f32.mrf.mxu1 }
 0x100   : > { %v631_v5 = vpop.f32.mrf.mxu0  ;;  %v760_v6 = vpop.f32.mrf.mxu1 }
 0x101   : > { %v641_v7 = vadd.f32 %v631_v5, %v501_v40  ;;  %v3828_v8 = vadd.f32 %v760_v6, %v639_v58 }
 0x102   : > { %v3023_v9 = vpop.f32.mrf.mxu0  ;;  %v3040_v10 = vpop.f32.mrf.mxu1 }
 0x104   : > { %v765_v11 = vpop.f32.mrf.mxu1  ;;  %v879_v12 = vpop.f32.mrf.mxu0 }
 0x105   : > { %v3830_v13 = vadd.f32 %v765_v11, %v640_v0  ;;  %v913_v4 = vadd.f32 %v879_v12, %v3820_v47 }
 0x106   : > { %v3043_v14 = vpop.f32.mrf.mxu1  ;;  %v3051_v15 = vpop.f32.mrf.mxu0 }
 0x108   : > { %v770_v16 = vpop.f32.mrf.mxu1  ;;  %v884_v17 = vpop.f32.mrf.mxu0 }
 0x109   : > { %v3832_v18 = vadd.f32 %v770_v16, %v641_v7  ;;  %v914_v11 = vadd.f32 %v884_v17, %v3822_v53 }
 0x10a   : > { %v3046_v19 = vpop.f32.mrf.mxu1  ;;  %v3054_v20 = vpop.f32.mrf.mxu0 }
 0x10c   : > { %v889_v21 = vpop.f32.mrf.mxu0  ;;  %v1017_v22 = vpop.f32.mrf.mxu1 }
 0x10d   : > { %v1051_v7 = vadd.f32 %v1017_v22, %v913_v4  ;;  %v915_v47 = vadd.f32 %v889_v21, %v3824_v59 }
 0x10e   : > { %v3057_v23 = vpop.f32.mrf.mxu0  ;;  %v3074_v24 = vpop.f32.mrf.mxu1 }
 0x110   : > { %v3834_v25 = vpop.f32.mrf.mxu0  ;;  %v1022_v26 = vpop.f32.mrf.mxu1 }
 0x111   : > { %v1052_v19 = vadd.f32 %v1022_v26, %v914_v11 }
 0x112   : > { %v3060_v27 = vpop.f32.mrf.mxu0  ;;  %v3077_v28 = vpop.f32.mrf.mxu1 }
 0x113   : > { %v3855_v27 = vld [vmem:[%s4200_s2] ss:$0 sm:$0xff] }
 0x114   : > { %v3836_v29 = vpop.f32.mrf.mxu0  ;;  %v1027_v30 = vpop.f32.mrf.mxu1 }
 0x116   : > { %v3063_v31 = vpop.f32.mrf.mxu0  ;;  %v3080_v32 = vpop.f32.mrf.mxu1 }
 0x117   : > { %v1053_v32 = vadd.f32 %v1027_v30, %v915_v47 }
 0x118   : > { %v3838_v33 = vpop.f32.mrf.mxu0  ;;  %v1032_v34 = vpop.f32.mrf.mxu1 }
 0x11a   : > { %v3066_v35 = vpop.f32.mrf.mxu0  ;;  %v3083_v36 = vpop.f32.mrf.mxu1 }
 0x11b   : > { %v916_v36 = vadd.f32 %v3834_v25, %v3826_v2 }
 0x11c   : > { %v3840_v37 = vpop.f32.mrf.mxu0  ;;  %v3842_v38 = vpop.f32.mrf.mxu1 }
 0x11d   : > { %v1054_v59 = vadd.f32 %v1032_v34, %v916_v36 }
 0x11e   : > { %v3069_v39 = vpop.f32.mrf.mxu0  ;;  %v3086_v40 = vpop.f32.mrf.mxu1 }
 0x120   : > { %v3844_v41 = vpop.f32.mrf.mxu1  ;;  %v1155_v42 = vpop.f32.mrf.mxu0 }
 0x121   : > { %v1189_v14 = vadd.f32 %v1155_v42, %v1051_v7 }
 0x122   : > { %v3089_v43 = vpop.f32.mrf.mxu1  ;;  %v3097_v44 = vpop.f32.mrf.mxu0 }
 0x124   : > { %v3846_v45 = vpop.f32.mrf.mxu1  ;;  %v1160_v46 = vpop.f32.mrf.mxu0 }
 0x125   : > { %v1190_v12 = vadd.f32 %v1160_v46, %v1052_v19 }
 0x126   : > { %v3092_v48 = vpop.f32.mrf.mxu1  ;;  %v3100_v49 = vpop.f32.mrf.mxu0 }
 0x127   : > { %v917_v48 = vadd.f32 %v3836_v29, %v3828_v8 }
 0x128   : > { %v1165_v50 = vpop.f32.mrf.mxu0  ;;  %v1293_v51 = vpop.f32.mrf.mxu1 }
 0x129   : > { %v1327_v20 = vadd.f32 %v1293_v51, %v1189_v14  ;;  %v1191_v39 = vadd.f32 %v1165_v50, %v1053_v32  ;;  %v1055_v2 = vadd.f32 %v3842_v38, %v917_v48  ;;  %v1528_v48 = vld [vmem:[%s4201_s3 + $0xd0] sm:$0xff] }
 0x12a   : > { %v3103_v52 = vpop.f32.mrf.mxu0  ;;  %v3120_v54 = vpop.f32.mrf.mxu1 }
 0x12c   : > { %v1170_v55 = vpop.f32.mrf.mxu0  ;;  %v1298_v56 = vpop.f32.mrf.mxu1 }
 0x12d   : > { %v1328_v53 = vadd.f32 %v1298_v56, %v1190_v12  ;;  %v1192_v49 = vadd.f32 %v1170_v55, %v1054_v59  ;;  %v918_v56 = vadd.f32 %v3838_v33, %v3830_v13  ;;  %v1505_v13 = vld [vmem:[%s4201_s3 + $0x18] sm:$0xff]  ;;  %v1516_v59 = vld [vmem:[%s4201_s3 + $0x70] sm:$0xff] }
 0x12e   : > { %v3106_v57 = vpop.f32.mrf.mxu0  ;;  %v3123_v58 = vpop.f32.mrf.mxu1 }
 0x12f   : > { %v1056_v8 = vadd.f32 %v3844_v41, %v918_v56  ;;  %v1525_v56 = vld [vmem:[%s4201_s3 + $0xb8] sm:$0xff] }
 0x130   : > { %v1175_v60 = vpop.f32.mrf.mxu0  ;;  %v1303_v61 = vpop.f32.mrf.mxu1 }
 0x131   : > { %v1329_v21 = vadd.f32 %v1303_v61, %v1191_v39  ;;  %v1193_v57 = vadd.f32 %v1175_v60, %v1055_v2  ;;  %v1518_v39 = vld [vmem:[%s4201_s3 + $0x80] sm:$0xff] }
 0x132   : > { %v3109_v62 = vpop.f32.mrf.mxu0  ;;  %v3126_v63 = vpop.f32.mrf.mxu1 }
 0x133   : > { %v919_v63 = vadd.f32 %v3840_v37, %v3832_v18  ;;  %v1504_v18 = vld [vmem:[%s4201_s3 + $0x10] sm:$0xff]  ;;  %v1521_v37 = vld [vmem:[%s4201_s3 + $0x98] sm:$0xff] }
 0x134   : > { %v1180_v0 = vpop.f32.mrf.mxu0  ;;  %v1308_v3 = vpop.f32.mrf.mxu1 }
 0x135   : > { %v1330_v25 = vadd.f32 %v1308_v3, %v1192_v49  ;;  %v1194_v3 = vadd.f32 %v1180_v0, %v1056_v8  ;;  %v1057_v41 = vadd.f32 %v3846_v45, %v919_v63  ;;  %v1534_v63 = vld [vmem:[%s4201_s3 + $0x100] sm:$0xff] }
 0x136   : > { %v3112_v5 = vpop.f32.mrf.mxu0  ;;  %v3129_v6 = vpop.f32.mrf.mxu1 }
 0x138   : > { %v3849_v9 = vpop.f32.mrf.mxu0  ;;  %v1313_v10 = vpop.f32.mrf.mxu1 }
 0x139   : > { %v1331_v29 = vadd.f32 %v1313_v10, %v1193_v57  ;;  %v1195_v45 = vadd.f32 %v3849_v9, %v1057_v41  ;;  %v1503_v9 = vld [vmem:[%s4201_s3 + $0x8] sm:$0xff]  ;;  %v1524_v57 = vld [vmem:[%s4201_s3 + $0xb0] sm:$0xff] }
 0x13a   : > { %v3115_v15 = vpop.f32.mrf.mxu0  ;;  %v3132_v16 = vpop.f32.mrf.mxu1 }
 0x13c   : > { %v1318_v23 = vpop.f32.mrf.mxu1  ;;  %v1431_v24 = vpop.f32.mrf.mxu0 }
 0x13d   : > { %v1465_v22 = vadd.f32 %v1431_v24, %v1327_v20  ;;  %v1332_v7 = vadd.f32 %v1318_v23, %v1194_v3  ;;  %v1520_v24 = vld [vmem:[%s4201_s3 + $0x90] sm:$0xff] }
 0x13e   : > { %v3135_v28 = vpop.f32.mrf.mxu1  ;;  %v3143_v31 = vpop.f32.mrf.mxu0 }
 0x13f   : > { %v1479_v17 = vadd.f32 %v3855_v27, %v1465_v22 }
 0x140   : > { %v1323_v26 = vpop.f32.mrf.mxu1  ;;  %v1436_v35 = vpop.f32.mrf.mxu0 }
 0x141   : > { %v1486_v40 = vmax.f32 %v1479_v17, 0.0  ;;  %v1466_v42 = vadd.f32 %v1436_v35, %v1328_v53  ;;  %v1333_v20 = vadd.f32 %v1323_v26, %v1195_v45  ;;  %v1502_v17 = vld [vmem:[%s4201_s3] sm:$0xff]  ;;  %v1519_v26 = vld [vmem:[%s4201_s3 + $0x88] sm:$0xff] }
 0x142   : > { %v3146_v43 = vpop.f32.mrf.mxu0  ;;  %v3138_v44 = vpop.f32.mrf.mxu1 }
 0x143   : > { %1494 = vst.msk [vmem:[#allocation2] sm:$0xff] %vm1493_vm3, %v1486_v40  ;;  %v1480_v30 = vadd.f32 %v3855_v27, %v1466_v42  ;;  %v1517_v43 = vld [vmem:[%s4201_s3 + $0x78] sm:$0xff] }
 0x144   : > { %v1441_v46 = vpop.f32.mrf.mxu0 }
 0x145   : > { %v1487_v51 = vmax.f32 %v1480_v30, 0.0  ;;  %v1467_v52 = vadd.f32 %v1441_v46, %v1329_v21  ;;  %v1529_v21 = vld [vmem:[%s4201_s3 + $0xd8] sm:$0xff]  ;;  %v1515_v46 = vld [vmem:[%s4201_s3 + $0x68] sm:$0xff] }
 0x146   : > { %v3149_v54 = vpop.f32.mrf.mxu0 }
 0x147   : > { %1495 = vst.msk [vmem:[#allocation2 + $0x8] sm:$0xff] %vm1493_vm3, %v1487_v51  ;;  %v1481_v34 = vadd.f32 %v3855_v27, %v1467_v52  ;;  %v1514_v51 = vld [vmem:[%s4201_s3 + $0x60] sm:$0xff]  ;;  %v1527_v52 = vld [vmem:[%s4201_s3 + $0xc8] sm:$0xff] }
 0x148   : > { %v1446_v50 = vpop.f32.mrf.mxu0 }
 0x149   : > { %v1488_v58 = vmax.f32 %v1481_v34, 0.0  ;;  %v1468_v61 = vadd.f32 %v1446_v50, %v1330_v25  ;;  %v1526_v25 = vld [vmem:[%s4201_s3 + $0xc0] sm:$0xff] }
 0x14a   : > { %v3152_v62 = vpop.f32.mrf.mxu0  ;;  %v1538_v44 = vld [vmem:[#allocation2] sm:$0xff] }
 0x14b   : > { %1496 = vst.msk [vmem:[#allocation2 + $0x10] sm:$0xff] %vm1493_vm3, %v1488_v58  ;;  %v1482_v38 = vadd.f32 %v3855_v27, %v1468_v61  ;;  %v1537_v58 = vld [vmem:[%s4201_s3 + $0x118] sm:$0xff]  ;;  %v1523_v61 = vld [vmem:[%s4201_s3 + $0xa8] sm:$0xff]  ;;  %v1536_v62 = vld [vmem:[%s4201_s3 + $0x110] sm:$0xff] }
 0x14c   : > { %v1451_v55 = vpop.f32.mrf.mxu0 }
 0x14d   : > { %v1489_v4 = vmax.f32 %v1482_v38, 0.0  ;;  %v1469_v5 = vadd.f32 %v1451_v55, %v1331_v29  ;;  %v1522_v29 = vld [vmem:[%s4201_s3 + $0xa0] sm:$0xff]  ;;  %v1535_v38 = vld [vmem:[%s4201_s3 + $0x108] sm:$0xff] }
 0x14e   : > { %v3155_v33 = vpop.f32.mrf.mxu0  ;;  %v1543_v60 = vld [vmem:[#allocation2 + $0x1] sm:$0xff] }
 0x14f   : > { %v1758_v6 = vld [vmem:[#allocation2 + $0x2] sm:$0xff]  ;;  %1497 = vst.msk [vmem:[#allocation2 + $0x18] sm:$0xff] %vm1493_vm3, %v1489_v4  ;;  %v1483_v10 = vadd.f32 %v3855_v27, %v1469_v5  ;;  %3171 = vmatmul.mubr.msk.f32.vlgmr.msra.gmra.mxu1 %vm1493_vm3, %v1543_v60  ;;  %v1533_v5 = vld [vmem:[%s4201_s3 + $0xf8] sm:$0xff] }
 0x150   : > { %3217 = vmatmul.mubr.msk.f32.vlgmr.msra.gmra.mxu0 %vm1493_vm3, %v1758_v6  ;;  %3186 = vmatpush3.msra.mxu1 %v1505_v13  ;;  %v1456_v0 = vpop.f32.mrf.mxu0  ;;  %v1539_v30 = vld [vmem:[#allocation2 + $0x8] sm:$0xff]  ;;  %v1532_v13 = vld [vmem:[%s4201_s3 + $0xf0] sm:$0xff]  ;;  %v1530_v6 = vld [vmem:[%s4201_s3 + $0xe0] sm:$0xff] }
 0x151   : > { %3173 = vmatprep.mubr.msk.f32.mxu1 %vm3391_vm1, %v3390_v1  ;;  %v1490_v11 = vmax.f32 %v1483_v10, 0.0  ;;  %v1470_v14 = vadd.f32 %v1456_v0, %v1332_v7  ;;  %3219 = vmatprep.mubr.msk.f32.mxu0 %vm3391_vm1, %v3390_v1  ;;  %v1531_v33 = vld [vmem:[%s4201_s3 + $0xe8] sm:$0xff] }
 0x152   : > { %3187 = vmatprep.subr.mxu1 %v3390_v1  ;;  %v3158_v15 = vpop.f32.mrf.mxu0  ;;  %v1544_v16 = vld [vmem:[#allocation2 + $0x9] sm:$0xff]  ;;  %3255 = vmatpush3.msra.mxu0 %v1521_v37 }
 0x153   : > { %v3895_v19 = vld [vmem:[#allocation2 + $0xa] sm:$0xff]  ;;  %3188 = vmatpush3.msra.mxu1 %v1504_v18  ;;  %1498 = vst.msk [vmem:[#allocation2 + $0x20] sm:$0xff] %vm1493_vm3, %v1490_v11  ;;  %v1484_v23 = vadd.f32 %v3855_v27, %v1470_v14  ;;  %3256 = vmatprep.subr.mxu0 %v3390_v1 }
 0x154   : > { %3174 = vmatmul.mubr.msk.f32.gmra.mxu1 %vm1493_vm3, %v1544_v16  ;;  %3220 = vmatmul.mubr.msk.f32.gmra.mxu0 %vm1493_vm3, %v3895_v19  ;;  %v1461_v47 = vpop.f32.mrf.mxu0  ;;  %v1540_v49 = vld [vmem:[#allocation2 + $0x10] sm:$0xff] }
 0x155   : > { %3176 = vmatprep.mubr.msk.f32.mxu1 %vm3391_vm1, %v3390_v1  ;;  %3222 = vmatprep.mubr.msk.f32.mxu0 %vm3391_vm1, %v3390_v1  ;;  %v1491_v12 = vmax.f32 %v1484_v23, 0.0  ;;  %v1471_v22 = vadd.f32 %v1461_v47, %v1333_v20 }
 0x156   : > { %3189 = vmatprep.subr.mxu1 %v3390_v1  ;;  %v3914_v28 = vld [vmem:[#allocation2 + $0x11] sm:$0xff]  ;;  %3257 = vmatpush3.msra.mxu0 %v1520_v24  ;;  %v3161_v32 = vpop.f32.mrf.mxu0 }
 0x157   : > { %v3916_v31 = vld [vmem:[#allocation2 + $0x12] sm:$0xff]  ;;  %3190 = vmatpush3.msra.mxu1 %v1503_v9  ;;  %1499 = vst.msk [vmem:[#allocation2 + $0x28] sm:$0xff] %vm1493_vm3, %v1491_v12  ;;  %v1485_v53 = vadd.f32 %v3855_v27, %v1471_v22  ;;  %3258 = vmatprep.subr.mxu0 %v3390_v1 }
 0x158   : > { %3177 = vmatmul.mubr.msk.f32.gmra.mxu1 %vm1493_vm3, %v3914_v28  ;;  %3223 = vmatmul.mubr.msk.f32.gmra.mxu0 %vm1493_vm3, %v3916_v31  ;;  %v1541_v54 = vld [vmem:[#allocation2 + $0x18] sm:$0xff] }
 0x159   : > { %3179 = vmatprep.mubr.msk.f32.mxu1 %vm3391_vm1, %v3390_v1  ;;  %3225 = vmatprep.mubr.msk.f32.mxu0 %vm3391_vm1, %v3390_v1  ;;  %v1492_v27 = vmax.f32 %v1485_v53, 0.0 }
 0x15a   : > { %3191 = vmatprep.subr.mxu1 %v3390_v1  ;;  %v3936_v35 = vld [vmem:[#allocation2 + $0x19] sm:$0xff]  ;;  %3259 = vmatpush3.msra.mxu0 %v1519_v26  ;;  %v1547_v40 = vld [vmem:[#allocation2 + $0x21] sm:$0x1f] }
 0x15b   : > { %v3938_v36 = vld [vmem:[#allocation2 + $0x1a] sm:$0xff]  ;;  %3192 = vmatpush3.msra.mxu1 %v1502_v17  ;;  %1501 = vst.msk [vmem:[#allocation2 + $0x30] sm:$0x7f] %vm1500_vm4, %v1492_v27  ;;  %3260 = vmatprep.subr.mxu0 %v3390_v1  ;;  %v1762_v42 = vld [vmem:[#allocation2 + $0x22] sm:$0x1f] }
 0x15c   : > { %3180 = vmatmul.mubr.msk.f32.gmra.mxu1 %vm1493_vm3, %v3936_v35  ;;  %3226 = vmatmul.mubr.msk.f32.gmra.mxu0 %vm1493_vm3, %v3938_v36  ;;  %v1542_v34 = vld [vmem:[#allocation2 + $0x20] sm:$0x1f] }
 0x15d   : > { %3182 = vmatprep.mubr.msk.f32.mxu1 %vm3391_vm1, %v3390_v1  ;;  %3228 = vmatprep.mubr.msk.f32.mxu0 %vm3391_vm1, %v3390_v1  ;;  %v2220_v8 = vld [vmem:[#allocation2 + $0x20] sm:$0xff] }
 0x15e   : > { %3231 = vmatprep.subr.mxu1 %v3390_v1  ;;  %3261 = vmatpush3.msra.mxu0 %v1518_v39  ;;  %v4006_v2 = vld [vmem:[#allocation2 + $0x21] sm:$0xff]  ;;  %v1992_v50 = vld [vmem:[#allocation2 + $0x29] sm:$0x1f] }
 0x15f   : > { %3300 = vmatprep.subr.mxu0 %v3390_v1  ;;  %v2221_v55 = vld [vmem:[#allocation2 + $0x28] sm:$0xff] }
 0x160   : > { %3183 = vmatmul.mubr.msk.f32.gmra.mxu1 %vm1493_vm3, %v1547_v40  ;;  %3229 = vmatmul.mubr.msk.f32.gmra.mxu0 %vm1493_vm3, %v1762_v42  ;;  %v1877_v3 = vld [vmem:[#allocation2 + $0x28] sm:$0x1f] }
 0x161   : > { %3193 = vmatprep.mubr.msk.f32.mxu1 %vm3391_vm1, %v3390_v1  ;;  %3262 = vmatprep.mubr.msk.f32.mxu0 %vm3391_vm1, %v3390_v1  ;;  %v2450_v60 = vld [vmem:[#allocation2 + $0x22] sm:$0xff]  ;;  %v2107_v7 = vld [vmem:[#allocation2 + $0x2a] sm:$0x1f] }
 0x162   : > { %v2222_v4 = vld [vmem:[#allocation2 + $0x30] sm:$0x1f] }
 0x163   : > { %v2451_v41 = vld [vmem:[#allocation2 + $0x2a] sm:$0xff]  ;;  %v2452_v10 = vld [vmem:[#allocation2 + $0x32] sm:$0x1f] }
 0x164   : > { %3194 = vmatmul.mubr.msk.f32.vlgmr.msra.gmra.mxu1 %vm1493_vm3, %v1538_v44  ;;  %3263 = vmatmul.mubr.msk.f32.vlgmr.msra.gmra.mxu0 %vm1493_vm3, %v1544_v16  ;;  %v2336_v18 = vld [vmem:[#allocation2 + $0x29] sm:$0xff]  ;;  %v2337_v37 = vld [vmem:[#allocation2 + $0x31] sm:$0x1f] }
 0x165   : > { %3232 = vmatpush3.msra.mxu1 %v1517_v43  ;;  %3196 = vmatprep.mubr.msk.f32.mxu1 %vm3391_vm1, %v3390_v1 }
 0x166   : > { %3265 = vmatprep.mubr.msk.f32.mxu0 %vm3391_vm1, %v3390_v1  ;;  %3233 = vmatprep.subr.mxu1 %v3390_v1 }
 0x167   : > { %3234 = vmatpush3.msra.mxu1 %v1516_v59  ;;  %3301 = vmatpush3.msra.mxu0 %v1529_v21 }
 0x168   : > { %3197 = vmatmul.mubr.msk.f32.gmra.mxu1 %vm1493_vm3, %v1539_v30  ;;  %3266 = vmatmul.mubr.msk.f32.gmra.mxu0 %vm1493_vm3, %v3914_v28 }
 0x169   : > { %3199 = vmatprep.mubr.msk.f32.mxu1 %vm3391_vm1, %v3390_v1  ;;  %3268 = vmatprep.mubr.msk.f32.mxu0 %vm3391_vm1, %v3390_v1 }
 0x16a   : > { %3235 = vmatprep.subr.mxu1 %v3390_v1  ;;  %3302 = vmatprep.subr.mxu0 %v3390_v1 }
 0x16b   : > { %3236 = vmatpush3.msra.mxu1 %v1515_v46  ;;  %3303 = vmatpush3.msra.mxu0 %v1528_v48 }
 0x16c   : > { %3200 = vmatmul.mubr.msk.f32.gmra.mxu1 %vm1493_vm3, %v1540_v49  ;;  %3269 = vmatmul.mubr.msk.f32.gmra.mxu0 %vm1493_vm3, %v3936_v35 }
 0x16d   : > { %3202 = vmatprep.mubr.msk.f32.mxu1 %vm3391_vm1, %v3390_v1  ;;  %3271 = vmatprep.mubr.msk.f32.mxu0 %vm3391_vm1, %v3390_v1 }
 0x16e   : > { %3237 = vmatprep.subr.mxu1 %v3390_v1  ;;  %3304 = vmatprep.subr.mxu0 %v3390_v1 }
 0x16f   : > { %3238 = vmatpush3.msra.mxu1 %v1514_v51  ;;  %3305 = vmatpush3.msra.mxu0 %v1527_v52 }
 0x170   : > { %3203 = vmatmul.mubr.msk.f32.gmra.mxu1 %vm1493_vm3, %v1541_v54  ;;  %3272 = vmatmul.mubr.msk.f32.gmra.mxu0 %vm1493_vm3, %v4006_v2 }
 0x171   : > { %3205 = vmatprep.mubr.msk.f32.mxu1 %vm3391_vm1, %v3390_v1  ;;  %3274 = vmatprep.mubr.msk.f32.mxu0 %vm3391_vm1, %v3390_v1 }
 0x172   : > { %3306 = vmatprep.subr.mxu0 %v3390_v1  ;;  %3277 = vmatprep.subr.mxu1 %v3390_v1 }
 0x173   : > { %3307 = vmatpush3.msra.mxu0 %v1526_v25 }
 0x174   : > { %3206 = vmatmul.mubr.msk.f32.gmra.mxu1 %vm1493_vm3, %v1542_v34  ;;  %3275 = vmatmul.mubr.msk.f32.gmra.mxu0 %vm1493_vm3, %v1992_v50 }
 0x175   : > { %3239 = vmatprep.mubr.msk.f32.mxu1 %vm3391_vm1, %v3390_v1  ;;  %3308 = vmatprep.mubr.msk.f32.mxu0 %vm3391_vm1, %v3390_v1 }
 0x176   : > { %3346 = vmatprep.subr.mxu0 %v3390_v1 }
 0x178   : > { %3240 = vmatmul.mubr.msk.f32.vlgmr.msra.gmra.mxu1 %vm1493_vm3, %v1539_v30  ;;  %3309 = vmatmul.mubr.msk.f32.vlgmr.msra.gmra.mxu0 %vm1493_vm3, %v1540_v49 }
 0x179   : > { %3278 = vmatpush3.msra.mxu1 %v1525_v56  ;;  %3242 = vmatprep.mubr.msk.f32.mxu1 %vm3391_vm1, %v3390_v1 }
 0x17a   : > { %3311 = vmatprep.mubr.msk.f32.mxu0 %vm3391_vm1, %v3390_v1  ;;  %3279 = vmatprep.subr.mxu1 %v3390_v1 }
 0x17b   : > { %3280 = vmatpush3.msra.mxu1 %v1524_v57  ;;  %3347 = vmatpush3.msra.mxu0 %v1537_v58 }
 0x17c   : > { %3243 = vmatmul.mubr.msk.f32.gmra.mxu1 %vm1493_vm3, %v1540_v49  ;;  %3312 = vmatmul.mubr.msk.f32.gmra.mxu0 %vm1493_vm3, %v1541_v54 }
 0x17d   : > { %3245 = vmatprep.mubr.msk.f32.mxu1 %vm3391_vm1, %v3390_v1  ;;  %3314 = vmatprep.mubr.msk.f32.mxu0 %vm3391_vm1, %v3390_v1 }
 0x17e   : > { %3281 = vmatprep.subr.mxu1 %v3390_v1  ;;  %3348 = vmatprep.subr.mxu0 %v3390_v1 }
 0x17f   : > { %3282 = vmatpush3.msra.mxu1 %v1523_v61  ;;  %3349 = vmatpush3.msra.mxu0 %v1536_v62 }
 0x180   : > { %3246 = vmatmul.mubr.msk.f32.gmra.mxu1 %vm1493_vm3, %v1541_v54  ;;  %3315 = vmatmul.mubr.msk.f32.gmra.mxu0 %vm1493_vm3, %v2220_v8 }
 0x181   : > { %3248 = vmatprep.mubr.msk.f32.mxu1 %vm3391_vm1, %v3390_v1  ;;  %3317 = vmatprep.mubr.msk.f32.mxu0 %vm3391_vm1, %v3390_v1 }
 0x182   : > { %3283 = vmatprep.subr.mxu1 %v3390_v1  ;;  %3350 = vmatprep.subr.mxu0 %v3390_v1 }
 0x183   : > { %3284 = vmatpush3.msra.mxu1 %v1522_v29  ;;  %3351 = vmatpush3.msra.mxu0 %v1535_v38 }
 0x184   : > { %3249 = vmatmul.mubr.msk.f32.gmra.mxu1 %vm1493_vm3, %v2220_v8  ;;  %3318 = vmatmul.mubr.msk.f32.gmra.mxu0 %vm1493_vm3, %v2221_v55 }
 0x185   : > { %3251 = vmatprep.mubr.msk.f32.mxu1 %vm3391_vm1, %v3390_v1  ;;  %3320 = vmatprep.mubr.msk.f32.mxu0 %vm3391_vm1, %v3390_v1 }
 0x186   : > { %3352 = vmatprep.subr.mxu0 %v3390_v1  ;;  %3323 = vmatprep.subr.mxu1 %v3390_v1 }
 0x187   : > { %3353 = vmatpush3.msra.mxu0 %v1534_v63 }
 0x188   : > { %3252 = vmatmul.mubr.msk.f32.gmra.mxu1 %vm1493_vm3, %v1877_v3  ;;  %3321 = vmatmul.mubr.msk.f32.gmra.mxu0 %vm1493_vm3, %v2222_v4 }
 0x189   : > { %3285 = vmatprep.mubr.msk.f32.mxu1 %vm3391_vm1, %v3390_v1  ;;  %3354 = vmatprep.mubr.msk.f32.mxu0 %vm3391_vm1, %v3390_v1 }
 0x18c   : > { %3286 = vmatmul.mubr.msk.f32.vlgmr.msra.gmra.mxu1 %vm1493_vm3, %v3895_v19  ;;  %3355 = vmatmul.mubr.msk.f32.vlgmr.msra.gmra.mxu0 %vm1493_vm3, %v3916_v31 }
 0x18d   : > { %3324 = vmatpush3.msra.mxu1 %v1533_v5  ;;  %3288 = vmatprep.mubr.msk.f32.mxu1 %vm3391_vm1, %v3390_v1 }
 0x18e   : > { %3357 = vmatprep.mubr.msk.f32.mxu0 %vm3391_vm1, %v3390_v1  ;;  %3325 = vmatprep.subr.mxu1 %v3390_v1 }
 0x18f   : > { %3326 = vmatpush3.msra.mxu1 %v1532_v13 }
 0x190   : > { %3289 = vmatmul.mubr.msk.f32.gmra.mxu1 %vm1493_vm3, %v3916_v31  ;;  %3358 = vmatmul.mubr.msk.f32.gmra.mxu0 %vm1493_vm3, %v3938_v36 }
 0x191   : > { %3291 = vmatprep.mubr.msk.f32.mxu1 %vm3391_vm1, %v3390_v1  ;;  %3360 = vmatprep.mubr.msk.f32.mxu0 %vm3391_vm1, %v3390_v1 }
 0x192   : > { %3327 = vmatprep.subr.mxu1 %v3390_v1 }
 0x193   : > { %3328 = vmatpush3.msra.mxu1 %v1531_v33 }
 0x194   : > { %3292 = vmatmul.mubr.msk.f32.gmra.mxu1 %vm1493_vm3, %v3938_v36  ;;  %3361 = vmatmul.mubr.msk.f32.gmra.mxu0 %vm1493_vm3, %v2450_v60 }
 0x195   : > { %3294 = vmatprep.mubr.msk.f32.mxu1 %vm3391_vm1, %v3390_v1  ;;  %3363 = vmatprep.mubr.msk.f32.mxu0 %vm3391_vm1, %v3390_v1 }
 0x196   : > { %3329 = vmatprep.subr.mxu1 %v3390_v1 }
 0x197   : > { %3330 = vmatpush3.msra.mxu1 %v1530_v6 }
 0x198   : > { %3295 = vmatmul.mubr.msk.f32.gmra.mxu1 %vm1493_vm3, %v2450_v60  ;;  %3364 = vmatmul.mubr.msk.f32.gmra.mxu0 %vm1493_vm3, %v2451_v41 }
 0x199   : > { %3297 = vmatprep.mubr.msk.f32.mxu1 %vm3391_vm1, %v3390_v1  ;;  %3366 = vmatprep.mubr.msk.f32.mxu0 %vm3391_vm1, %v3390_v1 }
 0x19c   : > { %3298 = vmatmul.mubr.msk.f32.gmra.mxu1 %vm1493_vm3, %v2107_v7  ;;  %3367 = vmatmul.mubr.msk.f32.gmra.mxu0 %vm1493_vm3, %v2452_v10 }
 0x19d   : > { %3331 = vmatprep.mubr.msk.f32.mxu1 %vm3391_vm1, %v3390_v1 }
 0x1a0   : > { %3332 = vmatmul.mubr.msk.f32.vlgmr.msra.gmra.mxu1 %vm1493_vm3, %v3914_v28 }
 0x1a1   : > { %3334 = vmatprep.mubr.msk.f32.mxu1 %vm3391_vm1, %v3390_v1 }
 0x1a4   : > { %3335 = vmatmul.mubr.msk.f32.gmra.mxu1 %vm1493_vm3, %v3936_v35 }
 0x1a5   : > { %3337 = vmatprep.mubr.msk.f32.mxu1 %vm3391_vm1, %v3390_v1 }
 0x1a8   : > { %3338 = vmatmul.mubr.msk.f32.gmra.mxu1 %vm1493_vm3, %v4006_v2 }
 0x1a9   : > { %3340 = vmatprep.mubr.msk.f32.mxu1 %vm3391_vm1, %v3390_v1 }
 0x1ac   : > { %3341 = vmatmul.mubr.msk.f32.gmra.mxu1 %vm1493_vm3, %v2336_v18 }
 0x1ad   : > { %3343 = vmatprep.mubr.msk.f32.mxu1 %vm3391_vm1, %v3390_v1 }
 0x1b0   : > { %3344 = vmatmul.mubr.msk.f32.gmra.mxu1 %vm1493_vm3, %v2337_v37 }
 0x20f   : > { %v1629_v0 = vpop.f32.mrf.mxu1 }
 0x210   : > { %v1844_v45 = vpop.f32.mrf.mxu0 }
 0x211   : > { %v3172_v11 = vpop.f32.mrf.mxu1 }
 0x212   : > { %v3218_v14 = vpop.f32.mrf.mxu0 }
 0x214   : > { %v1634_v15 = vpop.f32.mrf.mxu1  ;;  %v1849_v16 = vpop.f32.mrf.mxu0 }
 0x216   : > { %v3175_v19 = vpop.f32.mrf.mxu1  ;;  %v3221_v20 = vpop.f32.mrf.mxu0 }
 0x218   : > { %v1639_v23 = vpop.f32.mrf.mxu1  ;;  %v1854_v9 = vpop.f32.mrf.mxu0 }
 0x21a   : > { %v3178_v24 = vpop.f32.mrf.mxu1  ;;  %v3224_v47 = vpop.f32.mrf.mxu0 }
 0x21c   : > { %v1644_v12 = vpop.f32.mrf.mxu1  ;;  %v1859_v22 = vpop.f32.mrf.mxu0 }
 0x21e   : > { %v3181_v28 = vpop.f32.mrf.mxu1  ;;  %v3227_v31 = vpop.f32.mrf.mxu0 }
 0x220   : > { %v1649_v1 = vpop.f32.mrf.mxu1  ;;  %v1864_v32 = vpop.f32.mrf.mxu0 }
 0x222   : > { %v3184_v53 = vpop.f32.mrf.mxu1  ;;  %v3230_v17 = vpop.f32.mrf.mxu0 }
 0x224   : > { %v1734_v26 = vpop.f32.mrf.mxu1  ;;  %v4152_v27 = vpop.f32.mrf.mxu0 }
 0x225   : > { %v1735_v35 = vadd.f32 %v1734_v26, %v1629_v0 }
 0x226   : > { %v3195_v36 = vpop.f32.mrf.mxu1  ;;  %v3264_v39 = vpop.f32.mrf.mxu0 }
 0x227   : > { %v1868_v40 = vadd.f32 %v1844_v45, %v1735_v35 }
 0x228   : > { %v1739_v42 = vpop.f32.mrf.mxu1  ;;  %v4154_v43 = vpop.f32.mrf.mxu0 }
 0x229   : > { %v1740_v44 = vadd.f32 %v1739_v42, %v1634_v15 }
 0x22a   : > { %v3198_v59 = vpop.f32.mrf.mxu1  ;;  %v3267_v21 = vpop.f32.mrf.mxu0 }
 0x22b   : > { %v1869_v30 = vadd.f32 %v1849_v16, %v1740_v44 }
 0x22c   : > { %v1744_v46 = vpop.f32.mrf.mxu1  ;;  %v4156_v48 = vpop.f32.mrf.mxu0 }
 0x22d   : > { %v1745_v49 = vadd.f32 %v1744_v46, %v1639_v23 }
 0x22e   : > { %v3201_v51 = vpop.f32.mrf.mxu1  ;;  %v3270_v52 = vpop.f32.mrf.mxu0 }
 0x22f   : > { %v1870_v54 = vadd.f32 %v1854_v9, %v1745_v49 }
 0x230   : > { %v1749_v2 = vpop.f32.mrf.mxu1  ;;  %v4158_v25 = vpop.f32.mrf.mxu0 }
 0x231   : > { %v1750_v34 = vadd.f32 %v1749_v2, %v1644_v12 }
 0x232   : > { %v3204_v50 = vpop.f32.mrf.mxu1  ;;  %v3273_v56 = vpop.f32.mrf.mxu0 }
 0x233   : > { %v1871_v57 = vadd.f32 %v1859_v22, %v1750_v34 }
 0x234   : > { %v1754_v58 = vpop.f32.mrf.mxu1  ;;  %v4160_v61 = vpop.f32.mrf.mxu0 }
 0x235   : > { %v1755_v62 = vadd.f32 %v1754_v58, %v1649_v1 }
 0x236   : > { %v3207_v8 = vpop.f32.mrf.mxu1  ;;  %v3276_v29 = vpop.f32.mrf.mxu0 }
 0x237   : > { %v4162_v38 = vadd.f32 %v1864_v32, %v1755_v62 }
 0x238   : > { %v1959_v55 = vpop.f32.mrf.mxu1  ;;  %v2304_v63 = vpop.f32.mrf.mxu0 }
 0x239   : > { %v1983_v1 = vadd.f32 %v1959_v55, %v1868_v40 }
 0x23a   : > { %v3241_v3 = vpop.f32.mrf.mxu1  ;;  %v3310_v4 = vpop.f32.mrf.mxu0 }
 0x23b   : > { %v2098_v36 = vadd.f32 %v4152_v27, %v1983_v1  ;;  %v2798_v27 = vld [vmem:[%s4202_s4] ss:$0 sm:$0xff] }
 0x23c   : > { %v1964_v5 = vpop.f32.mrf.mxu1  ;;  %v2309_v13 = vpop.f32.mrf.mxu0 }
 0x23d   : > { %v1984_v35 = vadd.f32 %v1964_v5, %v1869_v30 }
 0x23e   : > { %v3244_v33 = vpop.f32.mrf.mxu1  ;;  %v3313_v60 = vpop.f32.mrf.mxu0 }
 0x23f   : > { %v2099_v49 = vadd.f32 %v4154_v43, %v1984_v35 }
 0x240   : > { %v1969_v6 = vpop.f32.mrf.mxu1  ;;  %v2314_v41 = vpop.f32.mrf.mxu0 }
 0x241   : > { %v1985_v46 = vadd.f32 %v1969_v6, %v1870_v54 }
 0x242   : > { %v3247_v7 = vpop.f32.mrf.mxu1  ;;  %v3316_v10 = vpop.f32.mrf.mxu0 }
 0x243   : > { %v2100_v30 = vadd.f32 %v4156_v48, %v1985_v46 }
 0x244   : > { %v1974_v18 = vpop.f32.mrf.mxu1  ;;  %v4164_v37 = vpop.f32.mrf.mxu0 }
 0x245   : > { %v1986_v50 = vadd.f32 %v1974_v18, %v1871_v57 }
 0x246   : > { %v3250_v0 = vpop.f32.mrf.mxu1  ;;  %v3319_v45 = vpop.f32.mrf.mxu0 }
 0x247   : > { %v2101_v48 = vadd.f32 %v4158_v25, %v1986_v50 }
 0x248   : > { %v1979_v11 = vpop.f32.mrf.mxu1  ;;  %v4166_v14 = vpop.f32.mrf.mxu0 }
 0x249   : > { %v1987_v57 = vadd.f32 %v1979_v11, %v4162_v38 }
 0x24a   : > { %v3253_v15 = vpop.f32.mrf.mxu1  ;;  %v3322_v16 = vpop.f32.mrf.mxu0 }
 0x24b   : > { %v2102_v33 = vadd.f32 %v4160_v61, %v1987_v57 }
 0x24c   : > { %v2189_v19 = vpop.f32.mrf.mxu1  ;;  %v2534_v20 = vpop.f32.mrf.mxu0 }
 0x24d   : > { %v2213_v44 = vadd.f32 %v2189_v19, %v2098_v36 }
 0x24e   : > { %v3287_v23 = vpop.f32.mrf.mxu1  ;;  %v3356_v9 = vpop.f32.mrf.mxu0 }
 0x24f   : > { %v2328_v2 = vadd.f32 %v2304_v63, %v2213_v44 }
 0x250   : > { %v2194_v24 = vpop.f32.mrf.mxu1  ;;  %v2539_v47 = vpop.f32.mrf.mxu0 }
 0x251   : > { %v2214_v40 = vadd.f32 %v2194_v24, %v2099_v49 }
 0x252   : > { %v3290_v12 = vpop.f32.mrf.mxu1  ;;  %v3359_v22 = vpop.f32.mrf.mxu0 }
 0x253   : > { %v2329_v54 = vadd.f32 %v2309_v13, %v2214_v40 }
 0x254   : > { %v2199_v28 = vpop.f32.mrf.mxu1  ;;  %v2544_v31 = vpop.f32.mrf.mxu0 }
 0x255   : > { %v2215_v62 = vadd.f32 %v2199_v28, %v2100_v30 }
 0x256   : > { %v3293_v32 = vpop.f32.mrf.mxu1  ;;  %v3362_v53 = vpop.f32.mrf.mxu0 }
 0x257   : > { %v2330_v5 = vadd.f32 %v2314_v41, %v2215_v62 }
 0x258   : > { %v2204_v17 = vpop.f32.mrf.mxu1  ;;  %v2549_v26 = vpop.f32.mrf.mxu0 }
 0x259   : > { %v2216_v3 = vadd.f32 %v2204_v17, %v2101_v48 }
 0x25a   : > { %v3296_v39 = vpop.f32.mrf.mxu1  ;;  %v3365_v42 = vpop.f32.mrf.mxu0 }
 0x25b   : > { %v2331_v38 = vadd.f32 %v4164_v37, %v2216_v3 }
 0x25c   : > { %v2209_v59 = vpop.f32.mrf.mxu1  ;;  %v2554_v21 = vpop.f32.mrf.mxu0 }
 0x25d   : > { %v2217_v10 = vadd.f32 %v2209_v59, %v2102_v33 }
 0x25e   : > { %v3299_v51 = vpop.f32.mrf.mxu1  ;;  %v3368_v52 = vpop.f32.mrf.mxu0 }
 0x25f   : > { %v2332_v61 = vadd.f32 %v4166_v14, %v2217_v10 }
 0x260   : > { %v2419_v34 = vpop.f32.mrf.mxu1 }
 0x261   : > { %v2443_v56 = vadd.f32 %v2419_v34, %v2328_v2 }
 0x262   : > { %v3333_v58 = vpop.f32.mrf.mxu1 }
 0x263   : > { %v2558_v8 = vadd.f32 %v2534_v20, %v2443_v56 }
 0x264   : > { %v2424_v43 = vpop.f32.mrf.mxu1 }
 0x265   : > { %v2570_v29 = vadd.f32 %v2798_v27, %v2558_v8  ;;  %v2444_v55 = vadd.f32 %v2424_v43, %v2329_v54 }
 0x266   : > { %v3336_v63 = vpop.f32.mrf.mxu1 }
 0x267   : > { %2575 = vst.msk [vmem:[%s4179_s30] sm:$0xff] %vm1493_vm3, %v2570_v29  ;;  %v2559_v4 = vadd.f32 %v2539_v47, %v2444_v55 }
 0x268   : > { %v2429_v13 = vpop.f32.mrf.mxu1 }
 0x269   : > { %v2571_v60 = vadd.f32 %v2798_v27, %v2559_v4  ;;  %v2445_v6 = vadd.f32 %v2429_v13, %v2330_v5 }
 0x26a   : > { %v3339_v7 = vpop.f32.mrf.mxu1 }
 0x26b   : > { %2576 = vst.msk [vmem:[%s4179_s30 + $0x8] sm:$0xff] %vm1493_vm3, %v2571_v60  ;;  %v2560_v25 = vadd.f32 %v2544_v31, %v2445_v6 }
 0x26c   : > { %v2434_v18 = vpop.f32.mrf.mxu1 }
 0x26d   : > { %v2572_v0 = vadd.f32 %v2798_v27, %v2560_v25  ;;  %v2446_v45 = vadd.f32 %v2434_v18, %v2331_v38 }
 0x26e   : > { %v3342_v11 = vpop.f32.mrf.mxu1 }
 0x26f   : > { %2577 = vst.msk [vmem:[%s4179_s30 + $0x10] sm:$0xff] %vm1493_vm3, %v2572_v0  ;;  %v2561_v41 = vadd.f32 %v2549_v26, %v2446_v45 }
 0x270   : > { %v2439_v15 = vpop.f32.mrf.mxu1 }
 0x271   : > { %v2573_v16 = vadd.f32 %v2798_v27, %v2561_v41  ;;  %v2447_v19 = vadd.f32 %v2439_v15, %v2332_v61 }
 0x272   : > { %v3345_v20 = vpop.f32.mrf.mxu1 }
 0x273   : > { %2578 = vst.msk [vmem:[%s4179_s30 + $0x18] sm:$0xff] %vm1493_vm3, %v2573_v16  ;;  %v2562_v23 = vadd.f32 %v2554_v21, %v2447_v19 }
 0x275   : > { %v2574_v9 = vadd.f32 %v2798_v27, %v2562_v23 }
 0x277   : > { %2580 = vst.msk [vmem:[%s4179_s30 + $0x20] sm:$0x1f] %vm2579_vm5, %v2574_v9 }
 0x278 PF: > { %s15_s18 = sadd.s32 1, %s3388_s18  }
 0x279   : > { %p12_p5 = scmp.ge.s32.totalorder %s15_s18, 4  }
 0x27b   :  { %14 = sbr.rel (!%p12_p5) target bundleno = 1 (0x1), region = 73 }

</bundles_post_ra>
